<compile_context>
chip_gen: v7x
topology: tpu7x:2x2x1
jax: 0.10.0
libtpu: 0.0.40
codegen_flags: <defaults>
</compile_context>

<pallas_src>
import functools

import jax
import jax.numpy as jnp
from jax import lax
from jax.experimental import pallas as pl
from jax.experimental.pallas import tpu as pltpu


# ----------------------------------------------------------------------------
# Kernel
# ----------------------------------------------------------------------------
def _cross_attention_kernel(qsrc_ref, kvsrc_ref,
                            wq_ref, bq_ref, wkv_ref, bkv_ref,
                            w1_ref, b1_ref, w2_ref, b2_ref,
                            gamma_ref, beta_ref,
                            o_ref,
                            q_sc, m_sc, l_sc, acc_sc,
                            *, cq_p, scale):
    kv_i = pl.program_id(2)

    @pl.when(kv_i == 0)
    def _init():
        # Project the (resident) query source once per (direction, batch) pair and
        # cache it with the softmax scale already folded in.
        xq = qsrc_ref[0, 0]                                               # [C, N] bf16
        q = jnp.dot(wq_ref[...], xq,
                    preferred_element_type=jnp.float32) + bq_ref[...]     # [cq_p, N]
        q_sc[...] = (q * scale).astype(jnp.bfloat16)
        m_sc[...] = jnp.full_like(m_sc, -jnp.inf)
        l_sc[...] = jnp.zeros_like(l_sc)
        acc_sc[...] = jnp.zeros_like(acc_sc)

    # Fused k/v projection of this KV tile: one [cq_p+C, C] x [C, tile_kv] matmul.
    y_t = kvsrc_ref[0, 0]                                                 # [C, tkv] bf16
    kvp = jnp.dot(wkv_ref[...], y_t,
                  preferred_element_type=jnp.float32) + bkv_ref[...]      # [cq_p+C, tkv]
    k_t = kvp[:cq_p].astype(jnp.bfloat16)                                 # [cq_p, tkv]
    v_t = kvp[cq_p:].astype(jnp.bfloat16)                                 # [C, tkv]

    # logits[j, i] = (scale * q[:, i]) . k[:, j]   ->   [tile_kv, N]
    logits = lax.dot_general(k_t, q_sc[...], (((0,), (0,)), ((), ())),
                             preferred_element_type=jnp.float32)

    # Online softmax over the KV axis (axis 0 of `logits`) == torch softmax(dim=-1).
    m_cur = jnp.max(logits, axis=0, keepdims=True)                        # [1, N]
    m_new = jnp.maximum(m_sc[...], m_cur)
    alpha = jnp.exp(m_sc[...] - m_new)                                    # [1, N] f32
    # bf16 exp (EUP bf16 on v6e/v7x; compiler upcasts on v5e); f32 denominator accum.
    p = jnp.exp((logits - m_new).astype(jnp.bfloat16))                    # [tkv, N] bf16
    l_sc[...] = alpha * l_sc[...] + jnp.sum(p, axis=0, keepdims=True,
                                            dtype=jnp.float32)
    # out[c, i] += sum_j v[c, j] * p[j, i]  -- contraction on p's leading axis,
    # no [N, N] transpose needed.
    acc_sc[...] = alpha * acc_sc[...] + jnp.dot(
        v_t, p, preferred_element_type=jnp.float32)
    m_sc[...] = m_new

    @pl.when(kv_i == pl.num_programs(2) - 1)
    def _finalize():
        out = acc_sc[...] * pl.reciprocal(l_sc[...], approx=True)         # [C, N] f32

        # channel MLP: Linear(C->C) -> ReLU -> Linear(C->C)
        h = jnp.dot(w1_ref[...], out.astype(jnp.bfloat16),
                    preferred_element_type=jnp.float32) + b1_ref[...]
        h = jnp.maximum(h, 0.0)
        h = jnp.dot(w2_ref[...], h.astype(jnp.bfloat16),
                    preferred_element_type=jnp.float32) + b2_ref[...]

        # LayerNorm([C, Z, H, W]) == normalize over the whole [C, N] block per sample.
        mean = jnp.mean(h)
        var = jnp.mean((h - mean) ** 2)
        hn = (h - mean) * lax.rsqrt(var + 1e-5)
        o_ref[0, 0] = (hn * gamma_ref[...] + beta_ref[...]).astype(o_ref.dtype)


# ----------------------------------------------------------------------------
# Wrapper
# ----------------------------------------------------------------------------
def cross_attention(params, x, y, *, tile_kv=None, vmem_limit_bytes=None):
    """CrossAttention.forward(x, y) -> (out_x, out_y).  x, y: [B, C, Z, H, W]."""
    B, C, Z, H, W = x.shape
    N = Z * H * W
    cq = params['wq'].shape[0]
    scale = float(cq) ** -0.5                 # torch: (C // 8) ** -0.5

    # Pad query/key channels to a sublane multiple so the kvp split is a free view.
    cq_p = ((cq + 7) // 8) * 8

    # Hardware-aware defaults (v7x has only 64 MiB VMEM per TensorCore).
    try:
        vmem_cap = int(pltpu.get_tpu_info().vmem_capacity_bytes)
    except Exception:
        vmem_cap = 64 * 1024 * 1024
    if tile_kv is None:
        tile_kv = 256 if vmem_cap <= 96 * 1024 * 1024 else 512
    tile_kv = min(tile_kv, N)
    assert N % tile_kv == 0, (N, tile_kv)
    if vmem_limit_bytes is None:
        vmem_limit_bytes = min(int(vmem_cap * 0.8), 96 * 1024 * 1024)

    # One stacked bf16 copy of the activations (halves wrapper-side HBM writes
    # vs two concatenated copies).  src[0] = x, src[1] = y, each [B, C, N].
    src = jnp.stack([x.reshape(B, C, N).astype(jnp.bfloat16),
                     y.reshape(B, C, N).astype(jnp.bfloat16)], axis=0)    # [2, B, C, N]

    # bf16 MXU operands and bf16 LayerNorm affine; biases stay f32.
    def padr(a, rows):
        return jnp.pad(a, ((0, rows - a.shape[0]),) + ((0, 0),) * (a.ndim - 1))

    wq = padr(params['wq'], cq_p).astype(jnp.bfloat16)
    bq = padr(params['bq'], cq_p)
    wkv = jnp.concatenate([padr(params['wk'], cq_p), params['wv']],
                          axis=0).astype(jnp.bfloat16)
    bkv = jnp.concatenate([padr(params['bk'], cq_p), params['bv']], axis=0)
    w1 = params['w1'].astype(jnp.bfloat16)
    w2 = params['w2'].astype(jnp.bfloat16)
    gamma = params['gamma'].astype(jnp.bfloat16)
    beta = params['beta'].astype(jnp.bfloat16)
    weights = [wq, bq, wkv, bkv, w1, params['b1'], w2, params['b2'], gamma, beta]

    def rep_spec(shape):
        nd = len(shape)
        return pl.BlockSpec(shape, lambda d, b, k, nd=nd: (0,) * nd)

    # Grid: (direction, batch, kv-tile).  pair (d, b): query source = src[d, b],
    # k/v source = src[1 - d, b];  d == 0 -> out_x, d == 1 -> out_y.
    grid = (2, B, N // tile_kv)
    kern = functools.partial(_cross_attention_kernel, cq_p=cq_p, scale=scale)
    out = pl.pallas_call(
        kern,
        out_shape=jax.ShapeDtypeStruct((2, B, C, N), jnp.bfloat16),
        grid=grid,
        in_specs=[pl.BlockSpec((1, 1, C, N), lambda d, b, k: (d, b, 0, 0)),
                  pl.BlockSpec((1, 1, C, tile_kv), lambda d, b, k: (1 - d, b, 0, k))]
                 + [rep_spec(w.shape) for w in weights],
        out_specs=pl.BlockSpec((1, 1, C, N), lambda d, b, k: (d, b, 0, 0)),
        scratch_shapes=[
            pltpu.VMEM((cq_p, N), jnp.bfloat16),   # cached scaled queries
            pltpu.VMEM((1, N), jnp.float32),       # running max
            pltpu.VMEM((1, N), jnp.float32),       # running sum
            pltpu.VMEM((C, N), jnp.float32),       # running V @ P accumulator
        ],
        compiler_params=pltpu.CompilerParams(
            dimension_semantics=("parallel", "parallel", "arbitrary"),
            vmem_limit_bytes=vmem_limit_bytes),
    )(src, src, *weights)

    out_x = out[0].reshape(B, C, Z, H, W)
    out_y = out[1].reshape(B, C, Z, H, W)
    return out_x, out_y


# ----------------------------------------------------------------------------
# Pure-JAX reference (f32, same bf16-rounded operands as the kernel feeds the MXU)
# ----------------------------------------------------------------------------
def cross_attention_ref(params, x, y):
    B, C, Z, H, W = x.shape
    N = Z * H * W
    r = lambda a: a.astype(jnp.bfloat16).astype(jnp.float32)
    wq, wk, wv = r(params['wq']), r(params['wk']), r(params['wv'])
    w1, w2 = r(params['w1']), r(params['w2'])
    bq, bk, bv = params['bq'], params['bk'], params['bv']
    b1, b2 = params['b1'], params['b2']
    g, be = r(params['gamma']), r(params['beta'])
    scale = float(wq.shape[0]) ** -0.5

    def one_direction(qs, ks):
        qsf = r(qs.reshape(B, C, N))
        ksf = r(ks.reshape(B, C, N))
        q = jnp.einsum('oc,bcn->bon', wq, qsf) + bq
        k = jnp.einsum('oc,bcn->bon', wk, ksf) + bk
        v = jnp.einsum('oc,bcn->bon', wv, ksf) + bv
        logits = scale * jnp.einsum('bci,bcj->bij', q, k)        # [B, Nq, Nk]
        attn = jax.nn.softmax(logits, axis=-1)
        out = jnp.einsum('bcj,bij->bci', v, attn)                # [B, C, N]
        h = jnp.einsum('oc,bcn->bon', w1, out) + b1
        h = jnp.maximum(h, 0.0)
        h = jnp.einsum('oc,bcn->bon', w2, h) + b2
        mean = h.mean(axis=(1, 2), keepdims=True)
        var = ((h - mean) ** 2).mean(axis=(1, 2), keepdims=True)
        hn = (h - mean) * lax.rsqrt(var + 1e-5)
        return (hn * g + be).reshape(B, C, Z, H, W)

    return one_direction(x, y), one_direction(y, x)


# ----------------------------------------------------------------------------
# Parameters (deterministic synthetic init)
# ----------------------------------------------------------------------------
def init_params(key, c, cq, n):
    # NOTE: the torch module hard-codes nn.LayerNorm([256, 4, 32, 32]); here the
    # LayerNorm affine is parametrized as [C, N] so the script runs at small shapes.
    ks = jax.random.split(key, 9)

    def w(k, shape, s):
        return s * jax.random.normal(k, shape, jnp.float32)

    return dict(
        wq=w(ks[0], (cq, c), 0.15), bq=w(ks[1], (cq, 1), 0.05),
        wk=w(ks[2], (cq, c), 0.15), bk=w(ks[3], (cq, 1), 0.05),
        wv=w(ks[4], (c, c), 0.10),  bv=w(ks[5], (c, 1), 0.05),
        w1=w(ks[6], (c, c), 0.10),  b1=0.02 * jnp.ones((c, 1), jnp.float32),
        w2=w(ks[7], (c, c), 0.10),  b2=0.02 * jnp.ones((c, 1), jnp.float32),
        gamma=1.0 + w(ks[8], (c, n), 0.05),
        beta=jnp.zeros((c, n), jnp.float32),
    )


if __name__ == "__main__":
    # Small shapes (module defaults are C=256, fts 4x32x32 -> N=4096).
    C = 64
    CQ = C // 8
    Z, H, W = 4, 8, 8
    N = Z * H * W                     # 256 -> two KV tiles of 128 (exercises online softmax)
    B = 2

    key = jax.random.PRNGKey(0)
    kp, kx, ky = jax.random.split(key, 3)
    params = init_params(kp, C, CQ, N)
    x = jax.random.normal(kx, (B, C, Z, H, W), jnp.float32)
    y = jax.random.normal(ky, (B, C, Z, H, W), jnp.float32)

    fn = jax.jit(functools.partial(cross_attention, tile_kv=128))
    out_x, out_y = fn(params, x, y)
    jax.block_until_ready((out_x, out_y))
    assert out_x.shape == (B, C, Z, H, W), out_x.shape
    assert out_y.shape == (B, C, Z, H, W), out_y.shape

    ref_x, ref_y = cross_attention_ref(params, x, y)
    err = max(float(jnp.max(jnp.abs(out_x.astype(jnp.float32) - ref_x))),
              float(jnp.max(jnp.abs(out_y.astype(jnp.float32) - ref_y))))
    assert err < 0.2, f"max abs error vs reference: {err}"

    print("KERNEL_OK")
</pallas_src>

<mosaic_0001>
module attributes {stable_mosaic.version = 11 : i64} {
  func.func @_cross_attention_kernel(%arg0: i32, %arg1: i32, %arg2: i32, %arg3: memref<1x1x64x256xbf16, #tpu.memory_space<vmem>>, %arg4: memref<1x1x64x128xbf16, #tpu.memory_space<vmem>>, %arg5: memref<8x64xbf16, #tpu.memory_space<vmem>>, %arg6: memref<8x1xf32, #tpu.memory_space<vmem>>, %arg7: memref<72x64xbf16, #tpu.memory_space<vmem>>, %arg8: memref<72x1xf32, #tpu.memory_space<vmem>>, %arg9: memref<64x64xbf16, #tpu.memory_space<vmem>>, %arg10: memref<64x1xf32, #tpu.memory_space<vmem>>, %arg11: memref<64x64xbf16, #tpu.memory_space<vmem>>, %arg12: memref<64x1xf32, #tpu.memory_space<vmem>>, %arg13: memref<64x256xbf16, #tpu.memory_space<vmem>>, %arg14: memref<64x256xbf16, #tpu.memory_space<vmem>>, %arg15: memref<1x1x64x256xbf16, #tpu.memory_space<vmem>>, %arg16: memref<8x256xbf16, #tpu.memory_space<vmem>>, %arg17: memref<1x256xf32, #tpu.memory_space<vmem>>, %arg18: memref<1x256xf32, #tpu.memory_space<vmem>>, %arg19: memref<64x256xf32, #tpu.memory_space<vmem>>) attributes {dimension_semantics = [#tpu.dimension_semantics<parallel>, #tpu.dimension_semantics<parallel>, #tpu.dimension_semantics<arbitrary>], iteration_bounds = array<i64: 2, 2, 2>, scalar_prefetch = 0 : i64, scratch_operands = 4 : i64, tpu.core_type = #tpu.core_type<tc>, window_params = [{transform_indices = @transform_0, window_bounds = array<i64: 1, 1, 64, 256>}, {transform_indices = @transform_1, window_bounds = array<i64: 1, 1, 64, 128>}, {pipeline_mode = #tpu.pipeline_mode<synchronous>, transform_indices = @transform_2, window_bounds = array<i64: 8, 64>}, {pipeline_mode = #tpu.pipeline_mode<synchronous>, transform_indices = @transform_3, window_bounds = array<i64: 8, 1>}, {pipeline_mode = #tpu.pipeline_mode<synchronous>, transform_indices = @transform_4, window_bounds = array<i64: 72, 64>}, {pipeline_mode = #tpu.pipeline_mode<synchronous>, transform_indices = @transform_5, window_bounds = array<i64: 72, 1>}, {pipeline_mode = #tpu.pipeline_mode<synchronous>, transform_indices = @transform_6, window_bounds = array<i64: 64, 64>}, {pipeline_mode = #tpu.pipeline_mode<synchronous>, transform_indices = @transform_7, window_bounds = array<i64: 64, 1>}, {pipeline_mode = #tpu.pipeline_mode<synchronous>, transform_indices = @transform_8, window_bounds = array<i64: 64, 64>}, {pipeline_mode = #tpu.pipeline_mode<synchronous>, transform_indices = @transform_9, window_bounds = array<i64: 64, 1>}, {pipeline_mode = #tpu.pipeline_mode<synchronous>, transform_indices = @transform_10, window_bounds = array<i64: 64, 256>}, {pipeline_mode = #tpu.pipeline_mode<synchronous>, transform_indices = @transform_11, window_bounds = array<i64: 64, 256>}, {transform_indices = @transform_12, window_bounds = array<i64: 1, 1, 64, 256>}]} {
    %c0_i32 = arith.constant 0 : i32
    %0 = arith.cmpi eq, %arg2, %c0_i32 : i32
    %1 = arith.extui %0 : i1 to i32
    %c0_i32_0 = arith.constant 0 : i32
    %2 = arith.cmpi ne, %1, %c0_i32_0 : i32
    scf.if %2 {
      %c0_29 = arith.constant 0 : index
      %c0_30 = arith.constant 0 : index
      %c0_31 = arith.constant 0 : index
      %c0_32 = arith.constant 0 : index
      %44 = vector.load %arg3[%c0_29, %c0_30, %c0_31, %c0_32] : memref<1x1x64x256xbf16, #tpu.memory_space<vmem>>, vector<1x1x64x256xbf16>
      %45 = vector.shape_cast %44 : vector<1x1x64x256xbf16> to vector<64x256xbf16>
      %c0_33 = arith.constant 0 : index
      %c0_34 = arith.constant 0 : index
      %46 = vector.load %arg5[%c0_33, %c0_34] : memref<8x64xbf16, #tpu.memory_space<vmem>>, vector<8x64xbf16>
      %cst_35 = arith.constant dense<0.000000e+00> : vector<8x256xf32>
      %47 = tpu.matmul %46, %45, %cst_35 {dimension_numbers = #tpu.dot_dimension_numbers<[1], [0], [0], [1], [0, 0, 1, 1], [], []>} : vector<8x64xbf16>, vector<64x256xbf16>, vector<8x256xf32> -> vector<8x256xf32>
      %c0_36 = arith.constant 0 : index
      %c0_37 = arith.constant 0 : index
      %48 = vector.load %arg6[%c0_36, %c0_37] : memref<8x1xf32, #tpu.memory_space<vmem>>, vector<8x1xf32>
      %49 = vector.broadcast %48 : vector<8x1xf32> to vector<8x256xf32>
      %50 = arith.addf %47, %49 : vector<8x256xf32>
      %cst_38 = arith.constant 0.353553385 : f32
      %51 = vector.broadcast %cst_38 : f32 to vector<8x256xf32>
      %52 = arith.mulf %50, %51 : vector<8x256xf32>
      %53 = arith.truncf %52 : vector<8x256xf32> to vector<8x256xbf16>
      %c0_39 = arith.constant 0 : index
      %c0_40 = arith.constant 0 : index
      %54 = vector.load %arg16[%c0_39, %c0_40] : memref<8x256xbf16, #tpu.memory_space<vmem>>, vector<8x256xbf16>
      tpu.vector_store %arg16[%c0_39, %c0_40], %53 {strides = array<i32>} : memref<8x256xbf16, #tpu.memory_space<vmem>>, vector<8x256xbf16>,
      %cst_41 = arith.constant 0xFF800000 : f32
      %55 = vector.broadcast %cst_41 : f32 to vector<1x256xf32>
      %c0_42 = arith.constant 0 : index
      %c0_43 = arith.constant 0 : index
      %56 = vector.load %arg17[%c0_42, %c0_43] : memref<1x256xf32, #tpu.memory_space<vmem>>, vector<1x256xf32>
      tpu.vector_store %arg17[%c0_42, %c0_43], %55 {strides = array<i32>} : memref<1x256xf32, #tpu.memory_space<vmem>>, vector<1x256xf32>,
      %cst_44 = arith.constant 0.000000e+00 : f32
      %57 = vector.broadcast %cst_44 : f32 to vector<1x256xf32>
      %c0_45 = arith.constant 0 : index
      %c0_46 = arith.constant 0 : index
      %58 = vector.load %arg18[%c0_45, %c0_46] : memref<1x256xf32, #tpu.memory_space<vmem>>, vector<1x256xf32>
      tpu.vector_store %arg18[%c0_45, %c0_46], %57 {strides = array<i32>} : memref<1x256xf32, #tpu.memory_space<vmem>>, vector<1x256xf32>,
      %cst_47 = arith.constant 0.000000e+00 : f32
      %59 = vector.broadcast %cst_47 : f32 to vector<64x256xf32>
      %c0_48 = arith.constant 0 : index
      %c0_49 = arith.constant 0 : index
      %60 = vector.load %arg19[%c0_48, %c0_49] : memref<64x256xf32, #tpu.memory_space<vmem>>, vector<64x256xf32>
      tpu.vector_store %arg19[%c0_48, %c0_49], %59 {strides = array<i32>} : memref<64x256xf32, #tpu.memory_space<vmem>>, vector<64x256xf32>,
    } else {
    }
    %c0 = arith.constant 0 : index
    %c0_1 = arith.constant 0 : index
    %c0_2 = arith.constant 0 : index
    %c0_3 = arith.constant 0 : index
    %3 = vector.load %arg4[%c0, %c0_1, %c0_2, %c0_3] : memref<1x1x64x128xbf16, #tpu.memory_space<vmem>>, vector<1x1x64x128xbf16>
    %4 = vector.shape_cast %3 : vector<1x1x64x128xbf16> to vector<64x128xbf16>
    %c0_4 = arith.constant 0 : index
    %c0_5 = arith.constant 0 : index
    %5 = vector.load %arg7[%c0_4, %c0_5] : memref<72x64xbf16, #tpu.memory_space<vmem>>, vector<72x64xbf16>
    %cst = arith.constant dense<0.000000e+00> : vector<72x128xf32>
    %6 = tpu.matmul %5, %4, %cst {dimension_numbers = #tpu.dot_dimension_numbers<[1], [0], [0], [1], [0, 0, 1, 1], [], []>} : vector<72x64xbf16>, vector<64x128xbf16>, vector<72x128xf32> -> vector<72x128xf32>
    %c0_6 = arith.constant 0 : index
    %c0_7 = arith.constant 0 : index
    %7 = vector.load %arg8[%c0_6, %c0_7] : memref<72x1xf32, #tpu.memory_space<vmem>>, vector<72x1xf32>
    %8 = vector.broadcast %7 : vector<72x1xf32> to vector<72x128xf32>
    %9 = arith.addf %6, %8 : vector<72x128xf32>
    %10 = vector.extract_strided_slice %9 {offsets = [0, 0], sizes = [8, 128], strides = [1, 1]} : vector<72x128xf32> to vector<8x128xf32>
    %11 = arith.truncf %10 : vector<8x128xf32> to vector<8x128xbf16>
    %12 = vector.extract_strided_slice %9 {offsets = [8, 0], sizes = [64, 128], strides = [1, 1]} : vector<72x128xf32> to vector<64x128xf32>
    %13 = arith.truncf %12 : vector<64x128xf32> to vector<64x128xbf16>
    %c0_8 = arith.constant 0 : index
    %c0_9 = arith.constant 0 : index
    %14 = vector.load %arg16[%c0_8, %c0_9] : memref<8x256xbf16, #tpu.memory_space<vmem>>, vector<8x256xbf16>
    %cst_10 = arith.constant dense<0.000000e+00> : vector<128x256xf32>
    %15 = tpu.matmul %11, %14, %cst_10 {dimension_numbers = #tpu.dot_dimension_numbers<[0], [0], [1], [1], [0, 1, 1, 1], [], []>} : vector<8x128xbf16>, vector<8x256xbf16>, vector<128x256xf32> -> vector<128x256xf32>
    %cst_11 = arith.constant dense<0xFF800000> : vector<256xf32>
    %16 = vector.multi_reduction <maximumf>, %15, %cst_11 [0] : vector<128x256xf32> to vector<256xf32>
    %17 = vector.shape_cast %16 : vector<256xf32> to vector<1x256xf32>
    %c0_12 = arith.constant 0 : index
    %c0_13 = arith.constant 0 : index
    %18 = vector.load %arg17[%c0_12, %c0_13] : memref<1x256xf32, #tpu.memory_space<vmem>>, vector<1x256xf32>
    %19 = arith.maximumf %18, %17 : vector<1x256xf32>
    %c0_14 = arith.constant 0 : index
    %c0_15 = arith.constant 0 : index
    %20 = vector.load %arg17[%c0_14, %c0_15] : memref<1x256xf32, #tpu.memory_space<vmem>>, vector<1x256xf32>
    %21 = arith.subf %20, %19 : vector<1x256xf32>
    %22 = math.exp %21 : vector<1x256xf32>
    %23 = vector.broadcast %19 : vector<1x256xf32> to vector<128x256xf32>
    %24 = arith.subf %15, %23 : vector<128x256xf32>
    %25 = arith.truncf %24 : vector<128x256xf32> to vector<128x256xbf16>
    %26 = math.exp %25 : vector<128x256xbf16>
    %c0_16 = arith.constant 0 : index
    %c0_17 = arith.constant 0 : index
    %27 = vector.load %arg18[%c0_16, %c0_17] : memref<1x256xf32, #tpu.memory_space<vmem>>, vector<1x256xf32>
    %28 = arith.mulf %22, %27 : vector<1x256xf32>
    %29 = arith.extf %26 : vector<128x256xbf16> to vector<128x256xf32>
    %cst_18 = arith.constant dense<0.000000e+00> : vector<256xf32>
    %30 = vector.multi_reduction <add>, %29, %cst_18 [0] : vector<128x256xf32> to vector<256xf32>
    %31 = vector.shape_cast %30 : vector<256xf32> to vector<1x256xf32>
    %32 = arith.addf %28, %31 : vector<1x256xf32>
    %c0_19 = arith.constant 0 : index
    %c0_20 = arith.constant 0 : index
    %33 = vector.load %arg18[%c0_19, %c0_20] : memref<1x256xf32, #tpu.memory_space<vmem>>, vector<1x256xf32>
    tpu.vector_store %arg18[%c0_19, %c0_20], %32 {strides = array<i32>} : memref<1x256xf32, #tpu.memory_space<vmem>>, vector<1x256xf32>,
    %c0_21 = arith.constant 0 : index
    %c0_22 = arith.constant 0 : index
    %34 = vector.load %arg19[%c0_21, %c0_22] : memref<64x256xf32, #tpu.memory_space<vmem>>, vector<64x256xf32>
    %35 = vector.broadcast %22 : vector<1x256xf32> to vector<64x256xf32>
    %36 = arith.mulf %35, %34 : vector<64x256xf32>
    %cst_23 = arith.constant dense<0.000000e+00> : vector<64x256xf32>
    %37 = tpu.matmul %13, %26, %cst_23 {dimension_numbers = #tpu.dot_dimension_numbers<[1], [0], [0], [1], [0, 0, 1, 1], [], []>} : vector<64x128xbf16>, vector<128x256xbf16>, vector<64x256xf32> -> vector<64x256xf32>
    %38 = arith.addf %36, %37 : vector<64x256xf32>
    %c0_24 = arith.constant 0 : index
    %c0_25 = arith.constant 0 : index
    %39 = vector.load %arg19[%c0_24, %c0_25] : memref<64x256xf32, #tpu.memory_space<vmem>>, vector<64x256xf32>
    tpu.vector_store %arg19[%c0_24, %c0_25], %38 {strides = array<i32>} : memref<64x256xf32, #tpu.memory_space<vmem>>, vector<64x256xf32>,
    %c0_26 = arith.constant 0 : index
    %c0_27 = arith.constant 0 : index
    %40 = vector.load %arg17[%c0_26, %c0_27] : memref<1x256xf32, #tpu.memory_space<vmem>>, vector<1x256xf32>
    tpu.vector_store %arg17[%c0_26, %c0_27], %19 {strides = array<i32>} : memref<1x256xf32, #tpu.memory_space<vmem>>, vector<1x256xf32>,
    %c1_i32 = arith.constant 1 : i32
    %41 = arith.cmpi eq, %arg2, %c1_i32 : i32
    %42 = arith.extui %41 : i1 to i32
    %c0_i32_28 = arith.constant 0 : i32
    %43 = arith.cmpi ne, %42, %c0_i32_28 : i32
    scf.if %43 {
      %c0_29 = arith.constant 0 : index
      %c0_30 = arith.constant 0 : index
      %44 = vector.load %arg19[%c0_29, %c0_30] : memref<64x256xf32, #tpu.memory_space<vmem>>, vector<64x256xf32>
      %c0_31 = arith.constant 0 : index
      %c0_32 = arith.constant 0 : index
      %45 = vector.load %arg18[%c0_31, %c0_32] : memref<1x256xf32, #tpu.memory_space<vmem>>, vector<1x256xf32>
      %46 = tpu.reciprocal %45 {approx = true} : vector<1x256xf32> -> vector<1x256xf32>
      %47 = vector.broadcast %46 : vector<1x256xf32> to vector<64x256xf32>
      %48 = arith.mulf %44, %47 : vector<64x256xf32>
      %c0_33 = arith.constant 0 : index
      %c0_34 = arith.constant 0 : index
      %49 = vector.load %arg9[%c0_33, %c0_34] : memref<64x64xbf16, #tpu.memory_space<vmem>>, vector<64x64xbf16>
      %50 = arith.truncf %48 : vector<64x256xf32> to vector<64x256xbf16>
      %cst_35 = arith.constant dense<0.000000e+00> : vector<64x256xf32>
      %51 = tpu.matmul %49, %50, %cst_35 {dimension_numbers = #tpu.dot_dimension_numbers<[1], [0], [0], [1], [0, 0, 1, 1], [], []>} : vector<64x64xbf16>, vector<64x256xbf16>, vector<64x256xf32> -> vector<64x256xf32>
      %c0_36 = arith.constant 0 : index
      %c0_37 = arith.constant 0 : index
      %52 = vector.load %arg10[%c0_36, %c0_37] : memref<64x1xf32, #tpu.memory_space<vmem>>, vector<64x1xf32>
      %53 = vector.broadcast %52 : vector<64x1xf32> to vector<64x256xf32>
      %54 = arith.addf %51, %53 : vector<64x256xf32>
      %cst_38 = arith.constant 0.000000e+00 : f32
      %55 = vector.broadcast %cst_38 : f32 to vector<64x256xf32>
      %56 = arith.maximumf %54, %55 : vector<64x256xf32>
      %c0_39 = arith.constant 0 : index
      %c0_40 = arith.constant 0 : index
      %57 = vector.load %arg11[%c0_39, %c0_40] : memref<64x64xbf16, #tpu.memory_space<vmem>>, vector<64x64xbf16>
      %58 = arith.truncf %56 : vector<64x256xf32> to vector<64x256xbf16>
      %cst_41 = arith.constant dense<0.000000e+00> : vector<64x256xf32>
      %59 = tpu.matmul %57, %58, %cst_41 {dimension_numbers = #tpu.dot_dimension_numbers<[1], [0], [0], [1], [0, 0, 1, 1], [], []>} : vector<64x64xbf16>, vector<64x256xbf16>, vector<64x256xf32> -> vector<64x256xf32>
      %c0_42 = arith.constant 0 : index
      %c0_43 = arith.constant 0 : index
      %60 = vector.load %arg12[%c0_42, %c0_43] : memref<64x1xf32, #tpu.memory_space<vmem>>, vector<64x1xf32>
      %61 = vector.broadcast %60 : vector<64x1xf32> to vector<64x256xf32>
      %62 = arith.addf %59, %61 : vector<64x256xf32>
      %63 = vector.shape_cast %62 : vector<64x256xf32> to vector<1x64x256xf32>
      %cst_44 = arith.constant dense<0.000000e+00> : vector<1xf32>
      %64 = vector.multi_reduction <add>, %63, %cst_44 [1, 2] : vector<1x64x256xf32> to vector<1xf32>
      %65 = vector.shape_cast %64 : vector<1xf32> to vector<1x1x1xf32>
      %66 = vector.extract %65[0, 0, 0] : f32 from vector<1x1x1xf32>
      %cst_45 = arith.constant 1.638400e+04 : f32
      %67 = arith.divf %66, %cst_45 : f32
      %68 = vector.broadcast %67 : f32 to vector<64x256xf32>
      %69 = arith.subf %62, %68 : vector<64x256xf32>
      %70 = arith.mulf %69, %69 : vector<64x256xf32>
      %71 = vector.shape_cast %70 : vector<64x256xf32> to vector<1x64x256xf32>
      %cst_46 = arith.constant dense<0.000000e+00> : vector<1xf32>
      %72 = vector.multi_reduction <add>, %71, %cst_46 [1, 2] : vector<1x64x256xf32> to vector<1xf32>
      %73 = vector.shape_cast %72 : vector<1xf32> to vector<1x1x1xf32>
      %74 = vector.extract %73[0, 0, 0] : f32 from vector<1x1x1xf32>
      %cst_47 = arith.constant 1.638400e+04 : f32
      %75 = arith.divf %74, %cst_47 : f32
      %76 = vector.broadcast %67 : f32 to vector<64x256xf32>
      %77 = arith.subf %62, %76 : vector<64x256xf32>
      %cst_48 = arith.constant 9.99999974E-6 : f32
      %78 = arith.addf %75, %cst_48 : f32
      %79 = math.rsqrt %78 : f32
      %80 = vector.broadcast %79 : f32 to vector<64x256xf32>
      %81 = arith.mulf %77, %80 : vector<64x256xf32>
      %c0_49 = arith.constant 0 : index
      %c0_50 = arith.constant 0 : index
      %82 = vector.load %arg13[%c0_49, %c0_50] : memref<64x256xbf16, #tpu.memory_space<vmem>>, vector<64x256xbf16>
      %83 = arith.extf %82 : vector<64x256xbf16> to vector<64x256xf32>
      %84 = arith.mulf %81, %83 : vector<64x256xf32>
      %c0_51 = arith.constant 0 : index
      %c0_52 = arith.constant 0 : index
      %85 = vector.load %arg14[%c0_51, %c0_52] : memref<64x256xbf16, #tpu.memory_space<vmem>>, vector<64x256xbf16>
      %86 = arith.extf %85 : vector<64x256xbf16> to vector<64x256xf32>
      %87 = arith.addf %84, %86 : vector<64x256xf32>
      %88 = arith.truncf %87 : vector<64x256xf32> to vector<64x256xbf16>
      %c0_53 = arith.constant 0 : index
      %c0_54 = arith.constant 0 : index
      %c0_55 = arith.constant 0 : index
      %c0_56 = arith.constant 0 : index
      %89 = vector.load %arg15[%c0_53, %c0_54, %c0_55, %c0_56] : memref<1x1x64x256xbf16, #tpu.memory_space<vmem>>, vector<1x1x64x256xbf16>
      %90 = vector.shape_cast %89 : vector<1x1x64x256xbf16> to vector<64x256xbf16>
      %91 = vector.shape_cast %88 : vector<64x256xbf16> to vector<1x1x64x256xbf16>
      tpu.vector_store %arg15[%c0_53, %c0_54, %c0_55, %c0_56], %91 {strides = array<i32>} : memref<1x1x64x256xbf16, #tpu.memory_space<vmem>>, vector<1x1x64x256xbf16>,
    } else {
    }
    return
  }
  func.func @transform_0(%arg0: i32, %arg1: i32, %arg2: i32) -> (i32, i32, i32, i32) {
    %c0_i32 = arith.constant 0 : i32
    %c0_i32_0 = arith.constant 0 : i32
    %c0_i32_1 = arith.constant 0 : i32
    return %arg0, %arg1, %c0_i32, %c0_i32_0 : i32, i32, i32, i32
  }
  func.func @transform_1(%arg0: i32, %arg1: i32, %arg2: i32) -> (i32, i32, i32, i32) {
    %c1_i32 = arith.constant 1 : i32
    %0 = arith.subi %c1_i32, %arg0 : i32
    %c0_i32 = arith.constant 0 : i32
    %c0_i32_0 = arith.constant 0 : i32
    return %0, %arg1, %c0_i32, %arg2 : i32, i32, i32, i32
  }
  func.func @transform_2(%arg0: i32, %arg1: i32, %arg2: i32) -> (i32, i32) {
    %c0_i32 = arith.constant 0 : i32
    %c0_i32_0 = arith.constant 0 : i32
    %c0_i32_1 = arith.constant 0 : i32
    return %c0_i32, %c0_i32_0 : i32, i32
  }
  func.func @transform_3(%arg0: i32, %arg1: i32, %arg2: i32) -> (i32, i32) {
    %c0_i32 = arith.constant 0 : i32
    %c0_i32_0 = arith.constant 0 : i32
    %c0_i32_1 = arith.constant 0 : i32
    return %c0_i32, %c0_i32_0 : i32, i32
  }
  func.func @transform_4(%arg0: i32, %arg1: i32, %arg2: i32) -> (i32, i32) {
    %c0_i32 = arith.constant 0 : i32
    %c0_i32_0 = arith.constant 0 : i32
    %c0_i32_1 = arith.constant 0 : i32
    return %c0_i32, %c0_i32_0 : i32, i32
  }
  func.func @transform_5(%arg0: i32, %arg1: i32, %arg2: i32) -> (i32, i32) {
    %c0_i32 = arith.constant 0 : i32
    %c0_i32_0 = arith.constant 0 : i32
    %c0_i32_1 = arith.constant 0 : i32
    return %c0_i32, %c0_i32_0 : i32, i32
  }
  func.func @transform_6(%arg0: i32, %arg1: i32, %arg2: i32) -> (i32, i32) {
    %c0_i32 = arith.constant 0 : i32
    %c0_i32_0 = arith.constant 0 : i32
    %c0_i32_1 = arith.constant 0 : i32
    return %c0_i32, %c0_i32_0 : i32, i32
  }
  func.func @transform_7(%arg0: i32, %arg1: i32, %arg2: i32) -> (i32, i32) {
    %c0_i32 = arith.constant 0 : i32
    %c0_i32_0 = arith.constant 0 : i32
    %c0_i32_1 = arith.constant 0 : i32
    return %c0_i32, %c0_i32_0 : i32, i32
  }
  func.func @transform_8(%arg0: i32, %arg1: i32, %arg2: i32) -> (i32, i32) {
    %c0_i32 = arith.constant 0 : i32
    %c0_i32_0 = arith.constant 0 : i32
    %c0_i32_1 = arith.constant 0 : i32
    return %c0_i32, %c0_i32_0 : i32, i32
  }
  func.func @transform_9(%arg0: i32, %arg1: i32, %arg2: i32) -> (i32, i32) {
    %c0_i32 = arith.constant 0 : i32
    %c0_i32_0 = arith.constant 0 : i32
    %c0_i32_1 = arith.constant 0 : i32
    return %c0_i32, %c0_i32_0 : i32, i32
  }
  func.func @transform_10(%arg0: i32, %arg1: i32, %arg2: i32) -> (i32, i32) {
    %c0_i32 = arith.constant 0 : i32
    %c0_i32_0 = arith.constant 0 : i32
    %c0_i32_1 = arith.constant 0 : i32
    return %c0_i32, %c0_i32_0 : i32, i32
  }
  func.func @transform_11(%arg0: i32, %arg1: i32, %arg2: i32) -> (i32, i32) {
    %c0_i32 = arith.constant 0 : i32
    %c0_i32_0 = arith.constant 0 : i32
    %c0_i32_1 = arith.constant 0 : i32
    return %c0_i32, %c0_i32_0 : i32, i32
  }
  func.func @transform_12(%arg0: i32, %arg1: i32, %arg2: i32) -> (i32, i32, i32, i32) {
    %c0_i32 = arith.constant 0 : i32
    %c0_i32_0 = arith.constant 0 : i32
    %c0_i32_1 = arith.constant 0 : i32
    return %arg0, %arg1, %c0_i32, %c0_i32_0 : i32, i32, i32, i32
  }
}

</mosaic_0001>

<bundles_post_ra>
// kernel: cross_attention.1
= control target key start
LH: loop header
LB: loop body
LE: loop exit
PB: predicated region body
PF: predicated region fallthrough
CT: control target
= control target key end

     0   :  { %s3455_s0 = inlined_call_operand.vmem [shape: bf16[2,2,64,256], index: 0, kind: input, shape index: {}, may-alias: {0,1}]   ;;  %s3456_s1 = inlined_call_operand.vmem [shape: bf16[2,2,64,256], index: 1, kind: input, shape index: {}, may-alias: {0,1}]   ;;  %s3457_s2 = inlined_call_operand.vmem [shape: bf16[8,64], index: 2, kind: input, shape index: {}]   ;;  %s3458_s3 = inlined_call_operand.vmem [shape: f32[8,1], index: 3, kind: input, shape index: {}]   ;;  %s3459_s4 = inlined_call_operand.vmem [shape: bf16[72,64], index: 4, kind: input, shape index: {}]   ;;  %s3460_s5 = inlined_call_operand.vmem [shape: f32[72,1], index: 5, kind: input, shape index: {}]   ;;  %s3461_s6 = inlined_call_operand.vmem [shape: bf16[64,64], index: 6, kind: input, shape index: {}]   ;;  %s3462_s7 = inlined_call_operand.vmem [shape: f32[64,1], index: 7, kind: input, shape index: {}]   ;;  %s3463_s8 = inlined_call_operand.vmem [shape: bf16[64,64], index: 8, kind: input, shape index: {}]   ;;  %s3464_s9 = inlined_call_operand.vmem [shape: f32[64,1], index: 9, kind: input, shape index: {}]   ;;  %s3465_s10 = inlined_call_operand.vmem [shape: bf16[64,256], index: 10, kind: input, shape index: {}]   ;;  %s3466_s11 = inlined_call_operand.vmem [shape: bf16[64,256], index: 11, kind: input, shape index: {}]   ;;  %s3467_s12 = inlined_call_operand.vmem [shape: bf16[2,2,64,256], index: 12, kind: output, shape index: {}]  }
   0x1   :  { %3478 = sst [smem:[#allocation11_spill]] %s3461_s6 }
   0x2   :  { %3479 = sst [smem:[#allocation12_spill]] %s3463_s8 }
   0x3   :  { %3480 = sst [smem:[#allocation13_spill]] %s3465_s10 }
   0x4   :  { %3481 = sst [smem:[#allocation14_spill]] %s3466_s11 }
   0x5   :  { %s2711_s21 = smov 0   ;;  %s2713_s22 = smov 0  }
   0x6   :  { %s2715_s23 = smov 0   ;;  %s2717_s24 = smov 0  }
   0x7   :  { %s2719_s25 = smov 0   ;;  %s2721_s26 = smov 0  }
   0x8   :  { %s2723_s27 = smov 0   ;;  %s2725_s28 = smov 0  }
   0x9   :  { %s2727_s29 = smov 0  }
   0xa LB: > { %3482 = sst [smem:[#allocation7_spill]] %s2632_s28  ;;  %s34_s30 = sadd.s32 1, %s2624_s26  ;;  %s2636_s29 = sphi %s2727_s29, %s22_s29   ;;  %s2632_s28 = sphi %s2725_s28, %s3502_s28   ;;  %s2628_s27 = sphi %s2723_s27, %s3508_s27   ;;  %s2624_s26 = sphi %s2721_s26, %s3507_s26   ;;  %s2620_s25 = sphi %s2719_s25, %s3499_s25   ;;  %s2616_s24 = sphi %s2717_s24, %s3506_s24   ;;  %s2612_s23 = sphi %s2715_s23, %s3505_s23   ;;  %s2608_s22 = sphi %s2713_s22, %s3504_s22   ;;  %s2604_s21 = sphi %s2711_s21, %s3503_s21  }
   0xb   : > { %p35_p0 = scmp.ge.s32.totalorder %s34_s30, 2  ;;  %s37_s13 = sadd.s32 1, %s2628_s27 }
   0xc   : > { %s41_s14 = sadd.s32 1, %s2632_s28  ;;  %p89_p1 = scmp.ne.s32.totalorder %s2608_s22, %s2604_s21 }
   0xd   : > { %s3510_s13 = smov (!%p35_p0, %s37_s13), %s2628_s27  ;;  %p90_p3 = scmp.eq.s32.totalorder %s2636_s29, 0 }
   0xe   : > { %p39_p2 = scmp.ge.s32.totalorder %s3510_s13, 2  ;;  %s3512_s30 = smov (%p35_p0, %s34_s30), 0 }
   0xf   : > { %3483 = sst [smem:[#allocation8_spill]] %s3512_s30  ;;  %p2768_p4 = por %p90_p3, %p89_p1 }
  0x10   : > { %s3514_s13 = smov (%p39_p2, %s3510_s13), 0  ;;  %s3516_s14 = smov (!%p39_p2, %s41_s14), %s2632_s28 }
  0x11   : > { %3484 = sst [smem:[#allocation9_spill]] %s3514_s13  ;;  %p43_p5 = scmp.ge.s32.totalorder %s3516_s14, 2 }
  0x12   : > { %s73_s16 = ssub.s32 1, %s2632_s28  ;;  %s76_s17 = ssub.s32 %s2628_s27, %s3514_s13 }
  0x13   : > { %s3518_s14 = smov (%p43_p5, %s3516_s14), 0  ;;  %s78_s19 = ssub.s32 %s2624_s26, %s3512_s30 }
  0x14   : > { %3486 = sst [smem:[#allocation10_spill]] %s3518_s14  ;;  %s74_s18 = ssub.s32 1, %s3518_s14 }
  0x15   : > { %s75_s20 = ssub.s32 %s73_s16, %s74_s18  ;;  %s82_s8 = sadd.s32 1, %s2608_s22 }
  0x16   : > { %s77_s11 = sor.u32 %s76_s17, %s75_s20  ;;  %p2268_p7 = scmp.ge.s32.totalorder %s2636_s29, 8 }
  0x17   : > { %s79_s10 = sor.u32 %s78_s19, %s77_s11 }
  0x18   : > { %p80_p6 = scmp.eq.s32.totalorder %s79_s10, 0  ;;  %383 = sbr.rel (%p2268_p7) target bundleno = 43 (0x2b), region = 56 }
  0x1a   : > { %s2782_s6 = scalar_select %p80_p6, %s2608_s22, %s82_s8  }
  0x1f   : > { %398 = sbr.rel (!%p2768_p4) target bundleno = 43 (0x2b), region = 64  ;;  %s400_s28 = sand.u32 (%p2768_p4), 1, %s2608_s22  }
  0x20   : > { %s2270_s13 = sshll.u32 (%p2768_p4), %s2628_s27, 4  ;;  %s2269_s14 = sshll.u32 (%p2768_p4), %s400_s28, 5 }
  0x21   : > { %s405_s30 = sadd.s32 (%p2768_p4), %s2624_s26, %s2270_s13  ;;  %s2271_s18 = sshll.u32 (%p2768_p4), %s73_s16, 5 }
  0x22   : > { %s407_s17 = sadd.s32 (%p2768_p4), %s2271_s18, %s405_s30  ;;  %s402_s20 = scalar_lea.vmem (%p2768_p4), [#allocation6], %s2269_s14 }
  0x23   : > { %s2272_s11 = sshll.u32 (%p2768_p4), %s407_s17, 2 }
  0x24   : > { %s409_s8 = scalar_lea.vmem (%p2768_p4), %s3456_s1, %s2272_s11 }
  0x25   : > { %v425_v0 = vld [vmem:[%s409_s8] sm:$0xf] (%p2768_p4)  ;;  %v427_v1 = vld [vmem:[%s409_s8 + $0x8] sm:$0xf] (%p2768_p4)  ;;  %v429_v2 = vld [vmem:[%s409_s8 + $0x10] sm:$0xf] (%p2768_p4) }
  0x26   : > { %426 = vst [vmem:[%s402_s20] sm:$0xf] %v425_v0  ;;  %428 = vst [vmem:[%s402_s20 + $0x4] sm:$0xf] %v427_v1  ;;  %v431_v3 = vld [vmem:[%s409_s8 + $0x18] sm:$0xf] }
  0x27   : > { %430 = vst [vmem:[%s402_s20 + $0x8] sm:$0xf] %v429_v2  ;;  %v433_v4 = vld [vmem:[%s409_s8 + $0x20] sm:$0xf]  ;;  %v435_v5 = vld [vmem:[%s409_s8 + $0x28] sm:$0xf] }
  0x28   : > { %432 = vst [vmem:[%s402_s20 + $0xc] sm:$0xf] %v431_v3  ;;  %434 = vst [vmem:[%s402_s20 + $0x10] sm:$0xf] %v433_v4  ;;  %v437_v6 = vld [vmem:[%s409_s8 + $0x30] sm:$0xf] }
  0x29   : > { %436 = vst [vmem:[%s402_s20 + $0x14] sm:$0xf] %v435_v5  ;;  %v439_v7 = vld [vmem:[%s409_s8 + $0x38] sm:$0xf]  ;;  %438 = vst [vmem:[%s402_s20 + $0x18] sm:$0xf] %v437_v6 }
  0x2a   : > { %440 = vst [vmem:[%s402_s20 + $0x1c] sm:$0xf] %v439_v7 }
  0x2b PF: > { %p2273_p8 = scmp.ge.s32.totalorder %s2636_s29, 1  ;;  %p478_p9 = scmp.lt.s32.totalorder %s2636_s29, 9 }
  0x2d   : > { %p479_p10 = pnand %p2273_p8, %p478_p9 }
  0x2e   : > { %s485_s28 = sand.u32 (!%p479_p10), 1, %s2604_s21   ;;  %p539_p11 = scmp.lt.s32.totalorder (!%p479_p10), %s2620_s25, 1 }
  0x2f   : > { %482 = sbr.rel (%p479_p10) target bundleno = 2266 (0x8da), region = 105  ;;  %s2274_s30 = sshll.u32 (!%p479_p10), %s485_s28, 5 }
  0x30   : > { %p541_p12 = scmp.lt.s32.totalorder (!%p479_p10), %s2616_s24, 1  ;;  %s2808_s20 = scalar_lea.vmem (!%p479_p10), [#allocation6], %s2274_s30 }
  0x31   : > { %p2281_p13 = scmp.ne.s32.totalorder (!%p479_p10), %s2612_s23, 0 }
  0x36   : > { %s3520_s25 = smov (!%p539_p11, %s2620_s25), 1  ;;  %s3522_s24 = smov (!%p541_p12, %s2616_s24), 1 }
  0x37   : > { %s2276_s13 = sshll.u32 %s3520_s25, 5  ;;  %s2275_s14 = sshll.u32 %s3522_s24, 4  ;;  %v2638_v10 = vmov (!%p2281_p13), 0   ;;  %v572_v14 = vld [vmem:[%s3458_s3] sm:$0xff] (!%p2281_p13)  ;;  %vm618_vm0 = vcmask (!%p2281_p13), 523264   ;;  %v674_v19 = vlaneseq (!%p2281_p13)  ;;  %v2639_v20 = vmov (!%p2281_p13), -inf  }
  0x38   : > { %s545_s15 = sadd.s32 %s2276_s13, %s2275_s14  ;;  %562 = sbr.rel (%p2281_p13) target bundleno = 296 (0x128), region = 113  ;;  %654 = vmatprep.mubr.bf16.mxu0 (!%p2281_p13), %v2638_v10  ;;  %2492 = vset.pattern.permute.xlu0 (!%p2281_p13), %v2638_v10  ;;  %v571_v18 = vld [vmem:[%s3457_s2] sm:$0xf] (!%p2281_p13)  ;;  %v2640_v21 = vmov (!%p2281_p13), 0.0  }
  0x39   : > { %s2277_s16 = sshll.u32 %s545_s15, 2  ;;  %575 = vperm.xlu0 (!%p2281_p13), %2492, %v572_v14   ;;  %vm676_vm1 = vcmp.lt.s32.totalorder (!%p2281_p13), %v674_v19, 256  ;;  %680 = vst [vmem:[#allocation5] sm:$0xff] (!%p2281_p13), %v2640_v21  ;;  %681 = vst [vmem:[#allocation5 + $0x8] sm:$0xff] (!%p2281_p13), %v2640_v21 }
  0x3a   : > { %s547_s11 = scalar_lea.vmem %s3455_s0, %s2277_s16  ;;  %s2806_s8 = scalar_lea.vmem %s3467_s12, %s2277_s16  ;;  %678 = vst.msk [vmem:[#allocation3] sm:$0x3] (!%p2281_p13), %vm676_vm1, %v2639_v20  ;;  %679 = vst.msk [vmem:[#allocation4] sm:$0x3] (!%p2281_p13), %vm676_vm1, %v2640_v21 }
  0x3b   : > { %v2493_v8 = vld [vmem:[%s547_s11 + $0x4] ss:$8 sps:$4 sm:$0xff] (!%p2281_p13)   ;;  %v2495_v9 = vld [vmem:[%s547_s11] ss:$8 sps:$4 sm:$0xff] (!%p2281_p13)   ;;  %v2496_v11 = vld [vmem:[%s547_s11 + $0x14] ss:$8 sps:$4 sm:$0xff] (!%p2281_p13)  }
  0x3c   : > { %622 = vmatprep.subr.bf16.mxu0 (!%p2281_p13), %v2493_v8  ;;  %v2498_v12 = vld [vmem:[%s547_s11 + $0x10] ss:$8 sps:$4 sm:$0xff] (!%p2281_p13)   ;;  %v2499_v13 = vld [vmem:[%s547_s11 + $0x24] ss:$8 sps:$4 sm:$0xff] (!%p2281_p13)   ;;  %v2501_v15 = vld [vmem:[%s547_s11 + $0x20] ss:$8 sps:$4 sm:$0xff] (!%p2281_p13)  }
  0x3d   : > { %623 = vmatpush1.bf16.msra.mxu0 (!%p2281_p13), %v2495_v9  ;;  %v2502_v16 = vld [vmem:[%s547_s11 + $0x34] ss:$8 sps:$4 sm:$0xff] (!%p2281_p13)   ;;  %v2504_v17 = vld [vmem:[%s547_s11 + $0x30] ss:$8 sps:$4 sm:$0xff] (!%p2281_p13)   ;;  %682 = vst [vmem:[#allocation5 + $0x10] sm:$0xff] (!%p2281_p13), %v2640_v21  ;;  %683 = vst [vmem:[#allocation5 + $0x18] sm:$0xff] (!%p2281_p13), %v2640_v21 }
  0x3e   : > { %624 = vmatprep.subr.bf16.mxu0 (!%p2281_p13), %v2496_v11  ;;  %684 = vst [vmem:[#allocation5 + $0x20] sm:$0xff] (!%p2281_p13), %v2640_v21  ;;  %685 = vst [vmem:[#allocation5 + $0x28] sm:$0xff] (!%p2281_p13), %v2640_v21 }
  0x3f   : > { %686 = vst [vmem:[#allocation5 + $0x30] sm:$0xff] %v2640_v21  ;;  %687 = vst [vmem:[#allocation5 + $0x38] sm:$0xff] %v2640_v21 }
  0x40   : > { %688 = vst [vmem:[#allocation5 + $0x40] sm:$0xff] %v2640_v21  ;;  %689 = vst [vmem:[#allocation5 + $0x48] sm:$0xff] %v2640_v21 }
  0x41   : > { %625 = vmatpush1.bf16.msra.mxu0 %v2498_v12  ;;  %690 = vst [vmem:[#allocation5 + $0x50] sm:$0xff] %v2640_v21  ;;  %691 = vst [vmem:[#allocation5 + $0x58] sm:$0xff] %v2640_v21 }
  0x42   : > { %626 = vmatprep.subr.bf16.mxu0 %v2499_v13  ;;  %692 = vst [vmem:[#allocation5 + $0x60] sm:$0xff] %v2640_v21  ;;  %693 = vst [vmem:[#allocation5 + $0x68] sm:$0xff] %v2640_v21 }
  0x43   : > { %694 = vst [vmem:[#allocation5 + $0x70] sm:$0xff] %v2640_v21  ;;  %695 = vst [vmem:[#allocation5 + $0x78] sm:$0xff] %v2640_v21 }
  0x45   : > { %627 = vmatpush1.bf16.msra.mxu0 %v2501_v15 }
  0x46   : > { %628 = vmatprep.subr.bf16.mxu0 %v2502_v16 }
  0x49   : > { %629 = vmatpush1.bf16.msra.mxu0 %v2504_v17 }
  0x4c   : > { %2290 = vmatmul.mubr.msk.bf16.vlgmr.msra.gmra.mrb[0].mxu0 %vm618_vm0, %v571_v18 }
  0xb8   : > { %v576_v22 = vpop.permute.xlu0 %575 }
 0x11f   : > { %v656_v23 = vpop.f32.mrb[0].mxu0 }
 0x120   : > { %v657_v24 = vadd.f32 %v656_v23, %v576_v22  ;;  %v658_v25 = vpop.f32.mrb[1].mxu0 }
 0x121   : > { %v659_v26 = vadd.f32 %v658_v25, %v576_v22  ;;  %v660_v27 = vpop.f32.mrb[2].mxu0 }
 0x122   : > { %v663_v28 = vmul.f32 0.35355338, %v657_v24  ;;  %v661_v29 = vpop.f32.mrb[3].mxu0 }
 0x123   : > { %v664_v30 = vmul.f32 0.35355338, %v659_v26 }
 0x125   : > { %v2344_v31 = vpack.c.bf16 %v664_v30, %v663_v28 }
 0x127   : > { %673 = vst [vmem:[#allocation2] sm:$0xff] %v2344_v31 }
 0x128 PF: > { %v2507_v32 = vld [vmem:[%s2808_s20] sm:$0xff]   ;;  %v2641_v33 = vmov 0.0   ;;  %v2508_v34 = vld [vmem:[%s2808_s20 + $0x8] sm:$0xff]   ;;  %vm2642_vm2 = vmmov 0   ;;  %v3476_v35 = vmov 0   ;;  %v2509_v36 = vld [vmem:[%s2808_s20 + $0x10] sm:$0xff]  }
 0x129   : > { %2362 = vmatprep.subr.bf16.mxu0 %v2641_v33  ;;  %2370 = vmatprep.mubr.msk.bf16.mxu0 %vm2642_vm2, %v2641_v33  ;;  %v713_v37 = vld [vmem:[%s3460_s5] sm:$0xff]  ;;  %v714_v38 = vld [vmem:[%s3460_s5 + $0x8] sm:$0xff]  ;;  %v715_v39 = vld [vmem:[%s3460_s5 + $0x10] sm:$0xff]  ;;  %vm814_vm3 = vcmask 523264   ;;  %vm954_vm4 = vcmask 1043456   ;;  %vm929_vm5 = vcmask 64512  }
 0x12a   : > { %2363 = vmatpush3.bf16.msra.mxu0 %v2507_v32  ;;  %2505 = vset.pattern.permute.xlu0 %v3476_v35  ;;  %v2510_v40 = vld [vmem:[%s2808_s20 + $0x18] sm:$0xff]   ;;  %v2515_v61 = vld [vmem:[%s3459_s4 + $0x10] sm:$0xff]   ;;  %v716_v62 = vld [vmem:[%s3460_s5 + $0x18] sm:$0xff]  ;;  %p2317_p0 = scmp.ne.s32.totalorder %s2612_s23, 1 }
 0x12b   : > { %2364 = vmatprep.subr.bf16.mxu0 %v2641_v33  ;;  %2506 = vset.pattern.permute.xlu1 %v3476_v35  ;;  %v2511_v41 = vld [vmem:[%s3459_s4] sm:$0xff]   ;;  %v2512_v42 = vld [vmem:[%s3459_s4 + $0x8] sm:$0xff]   ;;  %v2516_v0 = vld [vmem:[%s3459_s4 + $0x18] sm:$0xff]   ;;  %s3494_s11 = sld [smem:[#allocation11_spill]] (!%p2317_p0)  ;;  %s3495_s10 = sld [smem:[#allocation12_spill]] (!%p2317_p0) }
 0x12c   : > { %993 = vmatprep.mubr.bf16.mxu1 %v3476_v35  ;;  %724 = vperm.xlu0 %2505, %v713_v37   ;;  %v717_v63 = vld [vmem:[%s3460_s5 + $0x20] sm:$0xff]  ;;  %v718_v1 = vld [vmem:[%s3460_s5 + $0x28] sm:$0xff]  ;;  %v719_v2 = vld [vmem:[%s3460_s5 + $0x30] sm:$0xff]  ;;  %s3496_s19 = sld [smem:[#allocation13_spill]] (!%p2317_p0)  ;;  %s3497_s25 = sld [smem:[#allocation14_spill]] (!%p2317_p0) }
 0x12d   : > { %729 = vperm.xlu1 %2506, %v714_v38   ;;  %v2517_v3 = vld [vmem:[%s3459_s4 + $0x20] ss:$0 sps:$4 sm:$0xff]   ;;  %v720_v4 = vld [vmem:[%s3460_s5 + $0x38] sm:$0xff] }
 0x12e   : > { %2365 = vmatpush3.bf16.msra.mxu0 %v2508_v34  ;;  %v907_v43 = vld [vmem:[#allocation2] sm:$0xff] }
 0x12f   : > { %2366 = vmatprep.subr.bf16.mxu0 %v2641_v33  ;;  %v2307_v44 = vcombine.high %v907_v43, %v907_v43  ;;  %v2306_v45 = vcombine.low %v907_v43, %v907_v43  ;;  %v721_v13 = vld [vmem:[%s3460_s5 + $0x40] sm:$0xff] }
 0x131   : > { %734 = vperm.xlu1 %2506, %v715_v39   ;;  %2308 = vmatprep.subr.msk.bf16.mxu1 %vm954_vm4, %v2307_v44  ;;  %v956_v46 = vsel %vm954_vm4, %v2306_v45, 0 }
 0x132   : > { %2367 = vmatpush3.bf16.msra.mxu0 %v2509_v36  ;;  %962 = vmatpush1.bf16.msra.mxu1 %v956_v46 }
 0x133   : > { %2368 = vmatprep.subr.bf16.mxu0 %v2641_v33 }
 0x135   : > { %739 = vperm.xlu1 %2506, %v716_v62  }
 0x136   : > { %2369 = vmatpush3.bf16.msra.mxu0 %v2510_v40 }
 0x139   : > { %2371 = vmatmul.mubr.msk.bf16.vlgmr.msra.gmra.mrb[0].mxu0 %vm814_vm3, %v2511_v41  ;;  %744 = vperm.xlu1 %2506, %v717_v63  }
 0x13a   : > { %2374 = vmatprep.mubr.msk.bf16.mxu0 %vm2642_vm2, %v2641_v33 }
 0x13d   : > { %749 = vperm.xlu1 %2506, %v718_v1  }
 0x141   : > { %2375 = vmatmul.mubr.msk.bf16.gmra.mrb[4].mxu0 %vm814_vm3, %v2512_v42  ;;  %754 = vperm.xlu1 %2506, %v719_v2  }
 0x142   : > { %2378 = vmatprep.mubr.msk.bf16.mxu0 %vm2642_vm2, %v2641_v33 }
 0x145   : > { %759 = vperm.xlu1 %2506, %v720_v4  }
 0x149   : > { %2379 = vmatmul.mubr.msk.bf16.gmra.mrb[8].mxu0 %vm814_vm3, %v2515_v61  ;;  %764 = vperm.xlu1 %2506, %v721_v13  }
 0x14a   : > { %2382 = vmatprep.mubr.msk.bf16.mxu0 %vm2642_vm2, %v2641_v33 }
 0x151   : > { %2383 = vmatmul.mubr.msk.bf16.gmra.mrb[12].mxu0 %vm814_vm3, %v2516_v0 }
 0x152   : > { %2386 = vmatprep.mubr.msk.bf16.mxu0 %vm2642_vm2, %v2641_v33 }
 0x159   : > { %2387 = vmatmul.mubr.msk.bf16.gmra.mrb[16].mxu0 %vm814_vm3, %v2517_v3 }
 0x15a   : > { %1421 = vmatprep.mubr.bf16.mxu0 %v3476_v35 }
 0x1ab   : > { %v725_v47 = vpop.permute.xlu0 %724 }
 0x1ac   : > { %v730_v51 = vpop.permute.xlu1 %729 }
 0x1b0   : > { %v735_v55 = vpop.permute.xlu1 %734 }
 0x1b4   : > { %v740_v14 = vpop.permute.xlu1 %739 }
 0x1b8   : > { %v745_v15 = vpop.permute.xlu1 %744 }
 0x1bc   : > { %v750_v19 = vpop.permute.xlu1 %749 }
 0x1c0   : > { %v755_v23 = vpop.permute.xlu1 %754 }
 0x1c4   : > { %v760_v33 = vpop.permute.xlu1 %759 }
 0x1c8   : > { %v765_v42 = vpop.permute.xlu1 %764 }
 0x20c   : > { %v864_v48 = vpop.f32.mrb[0].mxu0 }
 0x20d   : > { %v865_v49 = vadd.f32 %v864_v48, %v725_v47  ;;  %v2372_v50 = vpop.f32.mrb[1].mxu0 }
 0x20e   : > { %v867_v52 = vpop.f32.mrb[2].mxu0 }
 0x20f   : > { %v902_v53 = vpack.c.bf16 %v865_v49, %v865_v49  ;;  %v2373_v54 = vpop.f32.mrb[3].mxu0  ;;  %v2851_v57 = vadd.f32 %v867_v52, %v730_v51 }
 0x211   : > { %908 = vxpose.xlu0.c.b16.start.end [1/1] (short) %v902_v53, 128 }
 0x214   : > { %v872_v56 = vpop.f32.mrb[4].mxu0 }
 0x215   : > { %v2853_v58 = vadd.f32 %v872_v56, %v735_v55  ;;  %v2376_v59 = vpop.f32.mrb[5].mxu0 }
 0x216   : > { %v875_v21 = vpop.f32.mrb[6].mxu0 }
 0x217   : > { %v2377_v22 = vpop.f32.mrb[7].mxu0  ;;  %v2932_v43 = vadd.f32 %v875_v21, %v740_v14 }
 0x21c   : > { %v880_v24 = vpop.f32.mrb[8].mxu0 }
 0x21d   : > { %v2380_v25 = vpop.f32.mrb[9].mxu0  ;;  %v2934_v44 = vadd.f32 %v880_v24, %v745_v15 }
 0x21e   : > { %v883_v27 = vpop.f32.mrb[10].mxu0 }
 0x21f   : > { %v2381_v30 = vpop.f32.mrb[11].mxu0  ;;  %v2936_v45 = vadd.f32 %v883_v27, %v750_v19 }
 0x224   : > { %v888_v37 = vpop.f32.mrb[12].mxu0 }
 0x225   : > { %v2384_v39 = vpop.f32.mrb[13].mxu0  ;;  %v2938_v46 = vadd.f32 %v888_v37, %v755_v23 }
 0x226   : > { %v891_v40 = vpop.f32.mrb[14].mxu0 }
 0x227   : > { %v2385_v41 = vpop.f32.mrb[15].mxu0  ;;  %v2942_v49 = vadd.f32 %v891_v40, %v760_v33 }
 0x22c   : > { %v896_v47 = vpop.f32.mrb[16].mxu0 }
 0x22d   : > { %v2944_v50 = vadd.f32 %v896_v47, %v765_v42  ;;  %v2388_v51 = vpop.f32.mrb[17].mxu0 }
 0x22e   : > { %v899_v56 = vpop.f32.mrb[18].mxu0 }
 0x22f   : > { %v2389_v63 = vpop.f32.mrb[19].mxu0 }
 0x277   : > { %v916_v5 = vpop.trf.xlu0 }
 0x278   : > { %2309 = vmatmul.mubr.msk.bf16.vlgmr.msra.gmra.mrb[0].mxu1 %vm929_vm5, %v916_v5 }
 0x279   : > { %1003 = vmatprep.mubr.bf16.mxu1 %v3476_v35 }
 0x27b   : > { %v917_v6 = vpop.trf.xlu0 }
 0x27f   : > { %v918_v7 = vpop.trf.xlu0 }
 0x280   : > { %2310 = vmatmul.mubr.msk.bf16.gmra.mrb[4].mxu1 %vm929_vm5, %v917_v6 }
 0x281   : > { %1013 = vmatprep.mubr.bf16.mxu1 %v3476_v35 }
 0x283   : > { %v919_v8 = vpop.trf.xlu0 }
 0x287   : > { %v920_v9 = vpop.trf.xlu0 }
 0x288   : > { %2311 = vmatmul.mubr.msk.bf16.gmra.mrb[8].mxu1 %vm929_vm5, %v918_v7 }
 0x289   : > { %1023 = vmatprep.mubr.bf16.mxu1 %v3476_v35 }
 0x28b   : > { %v921_v10 = vpop.trf.xlu0 }
 0x28f   : > { %v922_v11 = vpop.trf.xlu0 }
 0x290   : > { %2312 = vmatmul.mubr.msk.bf16.gmra.mrb[12].mxu1 %vm929_vm5, %v919_v8 }
 0x291   : > { %1033 = vmatprep.mubr.bf16.mxu1 %v3476_v35 }
 0x293   : > { %v923_v12 = vpop.trf.xlu0 }
 0x298   : > { %2313 = vmatmul.mubr.msk.bf16.gmra.mrb[16].mxu1 %vm929_vm5, %v920_v9 }
 0x299   : > { %1043 = vmatprep.mubr.bf16.mxu1 %v3476_v35 }
 0x2a0   : > { %2314 = vmatmul.mubr.msk.bf16.gmra.mrb[20].mxu1 %vm929_vm5, %v921_v10 }
 0x2a1   : > { %1053 = vmatprep.mubr.bf16.mxu1 %v3476_v35 }
 0x2a8   : > { %2315 = vmatmul.mubr.msk.bf16.gmra.mrb[24].mxu1 %vm929_vm5, %v922_v11 }
 0x2a9   : > { %1063 = vmatprep.mubr.bf16.mxu1 %v3476_v35 }
 0x2b0   : > { %2316 = vmatmul.mubr.msk.bf16.gmra.mrb[28].mxu1 %vm929_vm5, %v923_v12 }
 0x2b1   : > { %1451 = vmatprep.mubr.bf16.mxu1 %v3476_v35 }
 0x34b   : > { %v2908_v16 = vpop.f32.mrb[0].mxu1 }
 0x34c   : > { %v2910_v17 = vpop.f32.mrb[1].mxu1 }
 0x34d   : > { %v2912_v18 = vpop.f32.mrb[2].mxu1 }
 0x34e   : > { %v2914_v20 = vpop.f32.mrb[3].mxu1 }
 0x353   : > { %v2916_v26 = vpop.f32.mrb[4].mxu1 }
 0x354   : > { %v1074_v28 = vmax.f32 %v2908_v16, %v2916_v26  ;;  %v2920_v29 = vpop.f32.mrb[5].mxu1 }
 0x355   : > { %v1095_v31 = vmax.f32 %v2910_v17, %v2920_v29  ;;  %v2924_v32 = vpop.f32.mrb[6].mxu1 }
 0x356   : > { %v1075_v34 = vmax.f32 %v2912_v18, %v2924_v32  ;;  %v2928_v36 = vpop.f32.mrb[7].mxu1 }
 0x357   : > { %v1096_v38 = vmax.f32 %v2914_v20, %v2928_v36 }
 0x35b   : > { %v2940_v48 = vpop.f32.mrb[8].mxu1 }
 0x35c   : > { %v1076_v52 = vmax.f32 %v1074_v28, %v2940_v48  ;;  %v2947_v53 = vpop.f32.mrb[9].mxu1 }
 0x35d   : > { %v1097_v59 = vmax.f32 %v1095_v31, %v2947_v53  ;;  %v2954_v61 = vpop.f32.mrb[10].mxu1 }
 0x35e   : > { %v1077_v0 = vmax.f32 %v1075_v34, %v2954_v61  ;;  %v2959_v1 = vpop.f32.mrb[11].mxu1 }
 0x35f   : > { %v1098_v2 = vmax.f32 %v1096_v38, %v2959_v1 }
 0x363   : > { %v2962_v3 = vpop.f32.mrb[12].mxu1 }
 0x364   : > { %v1078_v4 = vmax.f32 %v1076_v52, %v2962_v3  ;;  %v2965_v5 = vpop.f32.mrb[13].mxu1 }
 0x365   : > { %v1099_v6 = vmax.f32 %v1097_v59, %v2965_v5  ;;  %v2968_v7 = vpop.f32.mrb[14].mxu1 }
 0x366   : > { %v1079_v8 = vmax.f32 %v1077_v0, %v2968_v7  ;;  %v2971_v9 = vpop.f32.mrb[15].mxu1 }
 0x367   : > { %v1100_v10 = vmax.f32 %v1098_v2, %v2971_v9 }
 0x36b   : > { %v2974_v11 = vpop.f32.mrb[16].mxu1 }
 0x36c   : > { %v1080_v12 = vmax.f32 %v1078_v4, %v2974_v11  ;;  %v2977_v13 = vpop.f32.mrb[17].mxu1 }
 0x36d   : > { %v1101_v14 = vmax.f32 %v1099_v6, %v2977_v13  ;;  %v2980_v15 = vpop.f32.mrb[18].mxu1 }
 0x36e   : > { %v1081_v19 = vmax.f32 %v1079_v8, %v2980_v15  ;;  %v2983_v21 = vpop.f32.mrb[19].mxu1 }
 0x36f   : > { %v1102_v22 = vmax.f32 %v1100_v10, %v2983_v21 }
 0x373   : > { %v2986_v23 = vpop.f32.mrb[20].mxu1 }
 0x374   : > { %v1082_v24 = vmax.f32 %v1080_v12, %v2986_v23  ;;  %v2989_v25 = vpop.f32.mrb[21].mxu1 }
 0x375   : > { %v1103_v27 = vmax.f32 %v1101_v14, %v2989_v25  ;;  %v2992_v28 = vpop.f32.mrb[22].mxu1 }
 0x376   : > { %v1083_v30 = vmax.f32 %v1081_v19, %v2992_v28  ;;  %v2995_v31 = vpop.f32.mrb[23].mxu1 }
 0x377   : > { %v1104_v33 = vmax.f32 %v1102_v22, %v2995_v31  ;;  %v2644_v22 = vmov 1966171168  }
 0x37b   : > { %v2998_v34 = vpop.f32.mrb[24].mxu1 }
 0x37c   : > { %v1084_v37 = vmax.f32 %v1082_v24, %v2998_v34  ;;  %v3001_v38 = vpop.f32.mrb[25].mxu1  ;;  %v1121_v24 = vunpack.c.l.s4 %v2644_v22 }
 0x37d   : > { %v1105_v39 = vmax.f32 %v1103_v27, %v3001_v38  ;;  %v3004_v40 = vpop.f32.mrb[26].mxu1  ;;  %v1123_v27 = vlaneseq }
 0x37e   : > { %v1085_v41 = vmax.f32 %v1083_v30, %v3004_v40  ;;  %v3007_v42 = vpop.f32.mrb[27].mxu1  ;;  %v1122_v55 = vunpack.c.0.s8 %v1121_v24 }
 0x37f   : > { %v1106_v47 = vmax.f32 %v1104_v33, %v3007_v42  ;;  %v1124_v54 = vshrl.u32 %v1123_v27, 7  ;;  %vm3030_vm6 = vcmp.lt.s32.totalorder %v1123_v27, 256 }
 0x383   : > { %v3010_v51 = vpop.f32.mrb[28].mxu1 }
 0x384   : > { %v1086_v52 = vmax.f32 %v1084_v37, %v3010_v51  ;;  %v3013_v56 = vpop.f32.mrb[29].mxu1 }
 0x385   : > { %v1107_v59 = vmax.f32 %v1105_v39, %v3013_v56  ;;  %v3016_v63 = vpop.f32.mrb[30].mxu1 }
 0x386   : > { %v1087_v0 = vmax.f32 %v1085_v41, %v3016_v63  ;;  %v3019_v2 = vpop.f32.mrb[31].mxu1 }
 0x387   : > { %v1108_v4 = vmax.f32 %v1106_v47, %v3019_v2  ;;  %v3022_v47 = vsub.s32 %v1122_v55, %v1124_v54 }
 0x388   : > { %v1088_v6 = vmax.f32 %v1086_v52, %v1087_v0  ;;  %v1116_v0 = vld [vmem:[#allocation3] sm:$0x3] }
 0x389   : > { %v1109_v8 = vmax.f32 %v1107_v59, %v1108_v4 }
 0x38a   : > { %v1089_v10 = vrot.slane %v1088_v6, 4 }
 0x38b   : > { %v1110_v12 = vrot.slane %v1109_v8, 4 }
 0x38c   : > { %v1090_v14 = vmax.f32 %v1088_v6, %v1089_v10  ;;  %v3026_v6 = vsub.s32 0, %v1124_v54 }
 0x38d   : > { %v1111_v19 = vmax.f32 %v1109_v8, %v1110_v12  ;;  %v3028_v8 = vsub.s32 1, %v1124_v54 }
 0x38e   : > { %v1091_v30 = vrot.slane %v1090_v14, 2 }
 0x38f   : > { %v1112_v33 = vrot.slane %v1111_v19, 2 }
 0x390   : > { %v1092_v37 = vmax.f32 %v1090_v14, %v1091_v30 }
 0x391   : > { %v1113_v39 = vmax.f32 %v1111_v19, %v1112_v33 }
 0x392   : > { %v1093_v41 = vrot.slane %v1092_v37, 1 }
 0x393   : > { %v1114_v35 = vrot.slane %v1113_v39, 1 }
 0x394   : > { %v1094_v62 = vmax.f32 %v1092_v37, %v1093_v41 }
 0x395   : > { %v1115_v60 = vmax.f32 %v1113_v39, %v1114_v35 }
 0x397   : > { %v1119_v52 = vcombine.low %v1094_v62, %v1115_v60 }
 0x399   : > { %v1126_v59 = vrot.slane %v1119_v52, %v3022_v47 }
 0x39b   : > { %v1133_v4 = vrot.slane %v1126_v59, %v3022_v47 }
 0x39d   : > { %v1135_v12 = vmax.f32 %v1116_v0, %v1133_v4 }
 0x39f   : > { %v1136_v14 = vsub.f32 %v1116_v0, %v1135_v12  ;;  %v1143_v35 = vrot.slane %v1135_v12, %v3026_v6  ;;  %v1147_v55 = vrot.slane %v1135_v12, %v3028_v8  ;;  %1494 = vst.msk [vmem:[#allocation3] sm:$0x3] %vm3030_vm6, %v1135_v12 }
 0x3a1   : > { %v1137_v60 = vmul.f32 1.442695, %v1136_v14  ;;  %v1150_v62 = vsub.f32 %v2908_v16, %v1143_v35  ;;  %v1151_v19 = vsub.f32 %v2910_v17, %v1147_v55  ;;  %v1152_v54 = vsub.f32 %v2912_v18, %v1143_v35 }
 0x3a2   : > { %v1153_v22 = vsub.f32 %v2914_v20, %v1147_v55  ;;  %v1154_v24 = vsub.f32 %v2916_v26, %v1143_v35  ;;  %v1155_v27 = vsub.f32 %v2920_v29, %v1147_v55  ;;  %v1156_v30 = vsub.f32 %v2924_v32, %v1143_v35 }
 0x3a3   : > { %2518 = vpow2.f32 %v1137_v60  ;;  %v1157_v33 = vsub.f32 %v2928_v36, %v1147_v55  ;;  %v1158_v37 = vsub.f32 %v2940_v48, %v1143_v35  ;;  %v1159_v39 = vsub.f32 %v2947_v53, %v1147_v55 }
 0x3a4   : > { %v1160_v16 = vsub.f32 %v2954_v61, %v1143_v35  ;;  %v1161_v17 = vsub.f32 %v2959_v1, %v1147_v55  ;;  %v1162_v18 = vsub.f32 %v2962_v3, %v1143_v35  ;;  %v1163_v20 = vsub.f32 %v2965_v5, %v1147_v55 }
 0x3a5   : > { %v1164_v26 = vsub.f32 %v2968_v7, %v1143_v35  ;;  %v1165_v29 = vsub.f32 %v2971_v9, %v1147_v55  ;;  %v1166_v32 = vsub.f32 %v2974_v11, %v1143_v35  ;;  %v1167_v36 = vsub.f32 %v2977_v13, %v1147_v55 }
 0x3a6   : > { %v1168_v48 = vsub.f32 %v2980_v15, %v1143_v35  ;;  %v1169_v53 = vsub.f32 %v2983_v21, %v1147_v55  ;;  %v1170_v61 = vsub.f32 %v2986_v23, %v1143_v35  ;;  %v1171_v1 = vsub.f32 %v2989_v25, %v1147_v55 }
 0x3a7   : > { %v1172_v3 = vsub.f32 %v2992_v28, %v1143_v35  ;;  %v1173_v5 = vsub.f32 %v2995_v31, %v1147_v55  ;;  %v1174_v7 = vsub.f32 %v2998_v34, %v1143_v35  ;;  %v1175_v9 = vsub.f32 %v3001_v38, %v1147_v55 }
 0x3a8   : > { %v1176_v11 = vsub.f32 %v3004_v40, %v1143_v35  ;;  %v1177_v13 = vsub.f32 %v3007_v42, %v1147_v55  ;;  %v1178_v15 = vsub.f32 %v3010_v51, %v1143_v35  ;;  %v1179_v21 = vsub.f32 %v3013_v56, %v1147_v55 }
 0x3a9   : > { %v1180_v23 = vsub.f32 %v3016_v63, %v1143_v35  ;;  %v1181_v25 = vsub.f32 %v3019_v2, %v1147_v55  ;;  %v1182_v41 = vpack.c.bf16 %v1152_v54, %v1150_v62  ;;  %v1183_v28 = vpack.c.bf16 %v1153_v22, %v1151_v19 }
 0x3aa   : > { %v1184_v52 = vpack.c.bf16 %v1156_v30, %v1154_v24  ;;  %v1185_v31 = vpack.c.bf16 %v1157_v33, %v1155_v27  ;;  %v1186_v59 = vpack.c.bf16 %v1160_v16, %v1158_v37  ;;  %v1187_v34 = vpack.c.bf16 %v1161_v17, %v1159_v39 }
 0x3ab   : > { %v1188_v0 = vpack.c.bf16 %v1164_v26, %v1162_v18  ;;  %v1189_v38 = vpack.c.bf16 %v1165_v29, %v1163_v20  ;;  %v1190_v4 = vpack.c.bf16 %v1168_v48, %v1166_v32  ;;  %v1191_v40 = vpack.c.bf16 %v1169_v53, %v1167_v36 }
 0x3ac   : > { %v1192_v12 = vpack.c.bf16 %v1172_v3, %v1170_v61  ;;  %v1193_v42 = vpack.c.bf16 %v1173_v5, %v1171_v1  ;;  %v3070_v14 = vpack.c.bf16 %v1176_v11, %v1174_v7  ;;  %v3072_v51 = vpack.c.bf16 %v1177_v13, %v1175_v9 }
 0x3ad   : > { %v3074_v56 = vpop.eup %2518  ;;  %v3076_v63 = vpack.c.bf16 %v1180_v23, %v1178_v15  ;;  %v3078_v2 = vpack.c.bf16 %v1181_v25, %v1179_v21  ;;  %v1199_v35 = vmul.bf16 1069105081, %v1182_v41  ;;  %v1202_v55 = vmul.bf16 1069105081, %v1183_v28 }
 0x3ae   : > { %v1205_v60 = vmul.bf16 1069105081, %v1184_v52  ;;  %v1208_v62 = vmul.bf16 1069105081, %v1185_v31  ;;  %v1211_v19 = vmul.bf16 1069105081, %v1186_v59  ;;  %v3082_v22 = vrot.slane %v3074_v56, %v3026_v6 }
 0x3af   : > { %2520 = vpow.bf16 %v1199_v35  ;;  %v1214_v54 = vmul.bf16 1069105081, %v1187_v34  ;;  %v1217_v24 = vmul.bf16 1069105081, %v1188_v0  ;;  %v3086_v27 = vrot.slane %v3074_v56, %v3028_v8 }
 0x3b0   : > { %2522 = vpow.bf16 %v1202_v55  ;;  %v1220_v30 = vmul.bf16 1069105081, %v1189_v38  ;;  %v1223_v33 = vmul.bf16 1069105081, %v1190_v4  ;;  %v1226_v37 = vmul.bf16 1069105081, %v1191_v40 }
 0x3b1   : > { %2524 = vpow.bf16 %v1205_v60  ;;  %v1229_v17 = vmul.bf16 1069105081, %v1192_v12  ;;  %v1232_v29 = vmul.bf16 1069105081, %v1193_v42  ;;  %v1235_v9 = vmul.bf16 1069105081, %v3070_v14 }
 0x3b2   : > { %2526 = vpow.bf16 %v1208_v62  ;;  %v1238_v15 = vmul.bf16 1069105081, %v3072_v51  ;;  %v1241_v34 = vmul.bf16 1069105081, %v3076_v63  ;;  %v1244_v4 = vmul.bf16 1069105081, %v3078_v2 }
 0x3b3   : > { %2528 = vpow.bf16 %v1211_v19 }
 0x3b4   : > { %2530 = vpow.bf16 %v1214_v54 }
 0x3b5   : > { %2532 = vpow.bf16 %v1217_v24 }
 0x3b6   : > { %2534 = vpow.bf16 %v1220_v30 }
 0x3b7   : > { %2536 = vpow.bf16 %v1223_v33 }
 0x3b8   : > { %2538 = vpow.bf16 %v1226_v37 }
 0x3b9   : > { %2540 = vpow.bf16 %v1229_v17 }
 0x3ba   : > { %v2521_v39 = vpop.eup %2520  ;;  %2542 = vpow.bf16 %v1232_v29 }
 0x3bb   : > { %v2523_v16 = vpop.eup %2522  ;;  %v1248_v18 = vunpack.c.l.bf16 %v2521_v39  ;;  %v1250_v20 = vunpack.c.h.bf16 %v2521_v39  ;;  %2544 = vpow.bf16 %v1235_v9 }
 0x3bc   : > { %v2525_v26 = vpop.eup %2524  ;;  %v1249_v32 = vunpack.c.l.bf16 %v2523_v16  ;;  %v1251_v36 = vunpack.c.h.bf16 %v2523_v16  ;;  %1389 = vmatprep.subr.bf16.mxu0 %v2523_v16  ;;  %2390 = vmatprep.subr.bf16.mxu1 %v2523_v16  ;;  %2546 = vpow.bf16 %v1238_v15 }
 0x3bd   : > { %v2527_v48 = vpop.eup %2526  ;;  %v1252_v53 = vunpack.c.l.bf16 %v2525_v26  ;;  %v1280_v61 = vadd.f32 %v1250_v20, %v1248_v18  ;;  %1390 = vmatpush1.bf16.msra.mxu0 %v2521_v39  ;;  %2398 = vmatpush1.bf16.msra.mxu1 %v2521_v39  ;;  %v1254_v11 = vunpack.c.h.bf16 %v2525_v26  ;;  %2548 = vpow.bf16 %v1241_v34 }
 0x3be   : > { %v2529_v1 = vpop.eup %2528  ;;  %v1253_v3 = vunpack.c.l.bf16 %v2527_v48  ;;  %v1301_v5 = vadd.f32 %v1251_v36, %v1249_v32  ;;  %1391 = vmatprep.subr.bf16.mxu0 %v2527_v48  ;;  %2391 = vmatprep.subr.bf16.mxu1 %v2527_v48  ;;  %v1255_v21 = vunpack.c.h.bf16 %v2527_v48  ;;  %2550 = vpow.bf16 %v1244_v4 }
 0x3bf   : > { %v2531_v7 = vpop.eup %2530  ;;  %v1281_v13 = vadd.f32 %v1280_v61, %v1252_v53  ;;  %v1256_v25 = vunpack.c.l.bf16 %v2529_v1  ;;  %v1258_v0 = vunpack.c.h.bf16 %v2529_v1 }
 0x3c0   : > { %v1302_v23 = vadd.f32 %v1301_v5, %v1253_v3  ;;  %v2533_v28 = vpop.eup %2532  ;;  %v1257_v52 = vunpack.c.l.bf16 %v2531_v7  ;;  %v1259_v40 = vunpack.c.h.bf16 %v2531_v7 }
 0x3c1   : > { %v1282_v41 = vadd.f32 %v1281_v13, %v1254_v11  ;;  %1392 = vmatpush1.bf16.msra.mxu0 %v2525_v26  ;;  %2399 = vmatpush1.bf16.msra.mxu1 %v2525_v26  ;;  %v2535_v59 = vpop.eup %2534  ;;  %v1260_v42 = vunpack.c.l.bf16 %v2533_v28  ;;  %v1262_v62 = vunpack.c.h.bf16 %v2533_v28 }
 0x3c2   : > { %v1303_v31 = vadd.f32 %v1302_v23, %v1255_v21  ;;  %1393 = vmatprep.subr.bf16.mxu0 %v2531_v7  ;;  %2392 = vmatprep.subr.bf16.mxu1 %v2531_v7  ;;  %v2537_v51 = vpop.eup %2536  ;;  %v1261_v35 = vunpack.c.l.bf16 %v2535_v59  ;;  %v1263_v19 = vunpack.c.h.bf16 %v2535_v59 }
 0x3c3   : > { %v1283_v38 = vadd.f32 %v1282_v41, %v1256_v25  ;;  %v2539_v60 = vpop.eup %2538  ;;  %v1264_v24 = vunpack.c.l.bf16 %v2537_v51  ;;  %v1266_v16 = vunpack.c.h.bf16 %v2537_v51 }
 0x3c4   : > { %v1304_v12 = vadd.f32 %v1303_v31, %v1257_v52  ;;  %v2541_v30 = vpop.eup %2540  ;;  %v1265_v33 = vunpack.c.l.bf16 %v2539_v60  ;;  %v1267_v18 = vunpack.c.h.bf16 %v2539_v60 }
 0x3c5   : > { %v1284_v14 = vadd.f32 %v1283_v38, %v1258_v0  ;;  %1394 = vmatpush1.bf16.msra.mxu0 %v2529_v1  ;;  %2400 = vmatpush1.bf16.msra.mxu1 %v2529_v1  ;;  %v2543_v39 = vpop.eup %2542  ;;  %v1268_v26 = vunpack.c.l.bf16 %v2541_v30  ;;  %v1270_v61 = vunpack.c.h.bf16 %v2541_v30 }
 0x3c6   : > { %v1305_v55 = vadd.f32 %v1304_v12, %v1259_v40  ;;  %1395 = vmatprep.subr.bf16.mxu0 %v2535_v59  ;;  %2393 = vmatprep.subr.bf16.mxu1 %v2535_v59  ;;  %v2545_v32 = vpop.eup %2544  ;;  %v1269_v36 = vunpack.c.l.bf16 %v2543_v39  ;;  %v1271_v3 = vunpack.c.h.bf16 %v2543_v39 }
 0x3c7   : > { %v1285_v63 = vadd.f32 %v1284_v14, %v1260_v42  ;;  %v2547_v53 = vpop.eup %2546  ;;  %v1272_v7 = vunpack.c.l.bf16 %v2545_v32  ;;  %v1274_v23 = vunpack.c.h.bf16 %v2545_v32 }
 0x3c8   : > { %v1306_v54 = vadd.f32 %v1305_v55, %v1261_v35  ;;  %v2549_v11 = vpop.eup %2548  ;;  %v1273_v13 = vunpack.c.l.bf16 %v2547_v53  ;;  %v1275_v41 = vunpack.c.h.bf16 %v2547_v53  ;;  %v3489_v35 = vpack.c.bf16 %v2853_v58, %v2851_v57 }
 0x3c9   : > { %v1286_v2 = vadd.f32 %v1285_v63, %v1262_v62  ;;  %1396 = vmatpush1.bf16.msra.mxu0 %v2533_v28  ;;  %2401 = vmatpush1.bf16.msra.mxu1 %v2533_v28  ;;  %v2551_v21 = vpop.eup %2550  ;;  %v1276_v52 = vunpack.c.l.bf16 %v2549_v11  ;;  %v1278_v0 = vunpack.c.h.bf16 %v2549_v11  ;;  %v3490_v55 = vpack.c.bf16 %v2944_v50, %v2942_v49  ;;  %v1246_v50 = vld [vmem:[#allocation4] sm:$0x3] }
 0x3ca   : > { %v1307_v37 = vadd.f32 %v1306_v54, %v1263_v19  ;;  %1397 = vmatprep.subr.bf16.mxu0 %v2539_v60  ;;  %2394 = vmatprep.subr.bf16.mxu1 %v2539_v60  ;;  %v1277_v59 = vunpack.c.l.bf16 %v2551_v21  ;;  %v1279_v4 = vunpack.c.h.bf16 %v2551_v21  ;;  %v3491_v62 = vmov 0  }
 0x3cb   : > { %v1287_v17 = vadd.f32 %v1286_v2, %v1264_v24 }
 0x3cc   : > { %v1308_v20 = vadd.f32 %v1307_v37, %v1265_v33  ;;  %v3492_v37 = vpack.c.bf16 %v2934_v44, %v2932_v43  ;;  %v1346_v43 = vld [vmem:[#allocation5] sm:$0xff] }
 0x3cd   : > { %v1288_v29 = vadd.f32 %v1287_v17, %v1266_v16  ;;  %1398 = vmatpush1.bf16.msra.mxu0 %v2537_v51  ;;  %2402 = vmatpush1.bf16.msra.mxu1 %v2537_v51  ;;  %v1247_v16 = vmul.f32 %v3074_v56, %v1246_v50  ;;  %v1358_v44 = vld [vmem:[#allocation5 + $0x60] sm:$0xff] }
 0x3ce   : > { %v1309_v48 = vadd.f32 %v1308_v20, %v1267_v18  ;;  %1399 = vmatprep.subr.bf16.mxu0 %v2543_v39  ;;  %2395 = vmatprep.subr.bf16.mxu1 %v2543_v39  ;;  %v3493_v18 = vpack.c.bf16 %v2938_v46, %v2936_v45  ;;  %v1385_v56 = vmul.f32 %v3082_v22, %v1358_v44 }
 0x3cf   : > { %v1289_v1 = vadd.f32 %v1288_v29, %v1268_v26  ;;  %v1347_v26 = vld [vmem:[#allocation5 + $0x8] sm:$0xff] }
 0x3d0   : > { %v1310_v5 = vadd.f32 %v1309_v48, %v1269_v36  ;;  %v1359_v29 = vld [vmem:[#allocation5 + $0x68] sm:$0xff]  ;;  %v1360_v36 = vld [vmem:[#allocation5 + $0x70] sm:$0xff]  ;;  %v1373_v48 = vmul.f32 %v3082_v22, %v1346_v43  ;;  %v1374_v45 = vmul.f32 %v3086_v27, %v1347_v26 }
 0x3d1   : > { %v1290_v9 = vadd.f32 %v1289_v1, %v1270_v61  ;;  %1400 = vmatpush1.bf16.msra.mxu0 %v2541_v30  ;;  %2403 = vmatpush1.bf16.msra.mxu1 %v2541_v30  ;;  %v1386_v46 = vmul.f32 %v3086_v27, %v1359_v29 }
 0x3d2   : > { %v1311_v15 = vadd.f32 %v1310_v5, %v1271_v3  ;;  %1401 = vmatprep.subr.bf16.mxu0 %v2547_v53  ;;  %2396 = vmatprep.subr.bf16.mxu1 %v2547_v53  ;;  %v1349_v53 = vld [vmem:[#allocation5 + $0x18] sm:$0xff] }
 0x3d3   : > { %v1291_v25 = vadd.f32 %v1290_v9, %v1272_v7 }
 0x3d4   : > { %v1312_v28 = vadd.f32 %v1311_v15, %v1273_v13 }
 0x3d5   : > { %v1292_v31 = vadd.f32 %v1291_v25, %v1274_v23  ;;  %1402 = vmatpush1.bf16.msra.mxu0 %v2545_v32  ;;  %2404 = vmatpush1.bf16.msra.mxu1 %v2545_v32  ;;  %v1348_v32 = vld [vmem:[#allocation5 + $0x10] sm:$0xff]  ;;  %v1376_v25 = vmul.f32 %v3086_v27, %v1349_v53 }
 0x3d6   : > { %v1313_v34 = vadd.f32 %v1312_v28, %v1275_v41  ;;  %1403 = vmatprep.subr.bf16.mxu0 %v2551_v21  ;;  %2397 = vmatprep.subr.bf16.mxu1 %v2551_v21  ;;  %v1375_v9 = vmul.f32 %v3082_v22, %v1348_v32 }
 0x3d7   : > { %v1293_v38 = vadd.f32 %v1292_v31, %v1276_v52 }
 0x3d8   : > { %v1314_v40 = vadd.f32 %v1313_v34, %v1277_v59 }
 0x3d9   : > { %v1294_v12 = vadd.f32 %v1293_v38, %v1278_v0  ;;  %1404 = vmatpush1.bf16.msra.mxu0 %v2549_v11  ;;  %2405 = vmatpush1.bf16.msra.mxu1 %v2549_v11  ;;  %v1387_v11 = vmul.f32 %v3082_v22, %v1360_v36  ;;  %v1350_v38 = vld [vmem:[#allocation5 + $0x20] sm:$0xff]  ;;  %v2645_v36 = vmov (!%p2317_p0), 0  }
 0x3da   : > { %v1315_v42 = vadd.f32 %v1314_v40, %v1279_v4  ;;  %v1351_v4 = vld [vmem:[#allocation5 + $0x28] sm:$0xff]  ;;  %v1352_v40 = vld [vmem:[#allocation5 + $0x30] sm:$0xff]  ;;  %2552 = vset.pattern.permute.xlu0 (!%p2317_p0), %v2645_v36  ;;  %2553 = vset.pattern.permute.xlu1 (!%p2317_p0), %v2645_v36 }
 0x3db   : > { %v1295_v14 = vrot.slane %v1294_v12, 4 }
 0x3dc   : > { %v1316_v51 = vrot.slane %v1315_v42, 4  ;;  %1422 = vmatmul.mubr.bf16.vlgmr.msra.gmra.mrb[20].mxu0 %v3489_v35  ;;  %1452 = vmatmul.mubr.bf16.vlgmr.msra.gmra.mrb[32].mxu1 %v3490_v55 }
 0x3dd   : > { %v1296_v60 = vadd.f32 %v1295_v14, %v1294_v12  ;;  %1431 = vmatprep.mubr.bf16.mxu0 %v3491_v62  ;;  %v1377_v12 = vmul.f32 %v3082_v22, %v1350_v38  ;;  %1857 = vmatprep.mubr.bf16.mxu1 (!%p2317_p0), %v2645_v36 }
 0x3de   : > { %v1317_v63 = vadd.f32 %v1316_v51, %v1315_v42  ;;  %v1353_v42 = vld [vmem:[#allocation5 + $0x38] sm:$0xff]  ;;  %v1378_v51 = vmul.f32 %v3086_v27, %v1351_v4 }
 0x3df   : > { %v1297_v19 = vrot.slane %v1296_v60, 2 }
 0x3e0   : > { %v1318_v54 = vrot.slane %v1317_v63, 2 }
 0x3e1   : > { %v1298_v24 = vadd.f32 %v1297_v19, %v1296_v60  ;;  %v1379_v60 = vmul.f32 %v3082_v22, %v1352_v40  ;;  %v1380_v19 = vmul.f32 %v3086_v27, %v1353_v42 }
 0x3e2   : > { %v1319_v2 = vadd.f32 %v1318_v54, %v1317_v63 }
 0x3e3   : > { %v1299_v30 = vrot.slane %v1298_v24, 1 }
 0x3e4   : > { %v1320_v33 = vrot.slane %v1319_v2, 1  ;;  %1432 = vmatmul.mubr.bf16.gmra.mrb[24].mxu0 %v3492_v37  ;;  %v1356_v37 = vld [vmem:[#allocation5 + $0x50] sm:$0xff] }
 0x3e5   : > { %v1300_v57 = vadd.f32 %v1299_v30, %v1298_v24  ;;  %1441 = vmatprep.mubr.bf16.mxu0 %v3491_v62  ;;  %v1354_v30 = vld [vmem:[#allocation5 + $0x40] sm:$0xff] }
 0x3e6   : > { %v1321_v58 = vadd.f32 %v1320_v33, %v1319_v2  ;;  %v1355_v33 = vld [vmem:[#allocation5 + $0x48] sm:$0xff] }
 0x3e7   : > { %v1382_v50 = vmul.f32 %v3086_v27, %v1355_v33 }
 0x3e8   : > { %v1324_v49 = vcombine.low %v1300_v57, %v1321_v58  ;;  %v1381_v57 = vmul.f32 %v3082_v22, %v1354_v30  ;;  %v1357_v58 = vld [vmem:[#allocation5 + $0x58] sm:$0xff] }
 0x3e9   : > { %v1384_v43 = vmul.f32 %v3086_v27, %v1357_v58  ;;  %v1745_v58 = vld [vmem:[%s3464_s9] sm:$0xff] (!%p2317_p0) }
 0x3ea   : > { %v1331_v39 = vrot.slane %v1324_v49, %v3022_v47 }
 0x3ec   : > { %v1338_v17 = vrot.slane %v1331_v39, %v3022_v47  ;;  %1442 = vmatmul.mubr.bf16.gmra.mrb[28].mxu0 %v3493_v18  ;;  %v1361_v47 = vld [vmem:[#allocation5 + $0x78] sm:$0xff] }
 0x3ed   : > { %v1388_v41 = vmul.f32 %v3086_v27, %v1361_v47  ;;  %1672 = vmatprep.mubr.bf16.mxu0 (!%p2317_p0), %v2645_v36  ;;  %v1562_v47 = vld [vmem:[%s3462_s7 + $0x10] sm:$0xff] (!%p2317_p0) }
 0x3ee   : > { %v1340_v20 = vadd.f32 %v1338_v17, %v1247_v16  ;;  %v1383_v17 = vmul.f32 %v3082_v22, %v1356_v37  ;;  %1580 = vperm.xlu1 (!%p2317_p0), %2553, %v1562_v47  }
 0x3f0   : > { %1345 = vst.msk [vmem:[#allocation4] sm:$0x3] %vm3030_vm6, %v1340_v20 }
 0x3f7   : > { %v1515_v32 = vld [vmem:[#allocation4] sm:$0x3] (!%p2317_p0) }
 0x3f8   : > { %2562 = vrcp.f32 (!%p2317_p0), %v1515_v32  ;;  %v2557_v32 = vld [vmem:[%s3494_s11 + $0x18] sm:$0xff] (!%p2317_p0)  }
 0x4af   : > { %v1423_v61 = vpop.f32.mrb[20].mxu0  ;;  %v1453_v1 = vpop.f32.mrb[32].mxu1 }
 0x4b0   : > { %v1462_v10 = vadd.f32 %v1423_v61, %v1373_v48  ;;  %v1474_v3 = vadd.f32 %v1453_v1, %v1385_v56  ;;  %v1425_v5 = vpop.f32.mrb[21].mxu0  ;;  %v1455_v7 = vpop.f32.mrb[33].mxu1  ;;  %v1560_v48 = vld [vmem:[%s3462_s7] sm:$0xff] (!%p2317_p0) }
 0x4b1   : > { %v1463_v13 = vadd.f32 %v1425_v5, %v1374_v45  ;;  %v1475_v15 = vadd.f32 %v1455_v7, %v1386_v46  ;;  %v1427_v21 = vpop.f32.mrb[22].mxu0  ;;  %v1457_v23 = vpop.f32.mrb[34].mxu1  ;;  %1570 = vperm.xlu0 (!%p2317_p0), %2552, %v1560_v48   ;;  %v1561_v46 = vld [vmem:[%s3462_s7 + $0x8] sm:$0xff] (!%p2317_p0) }
 0x4b2   : > { %1478 = vst [vmem:[#allocation5] sm:$0xff] %v1462_v10  ;;  %1490 = vst [vmem:[#allocation5 + $0x60] sm:$0xff] %v1474_v3  ;;  %v1464_v28 = vadd.f32 %v1427_v21, %v1375_v9  ;;  %v1476_v52 = vadd.f32 %v1457_v23, %v1387_v11  ;;  %v1429_v31 = vpop.f32.mrb[23].mxu0  ;;  %v1459_v59 = vpop.f32.mrb[35].mxu1  ;;  %v1563_v9 = vld [vmem:[%s3462_s7 + $0x18] sm:$0xff] (!%p2317_p0) }
 0x4b3   : > { %1479 = vst [vmem:[#allocation5 + $0x8] sm:$0xff] %v1463_v13  ;;  %1491 = vst [vmem:[#allocation5 + $0x68] sm:$0xff] %v1475_v15  ;;  %v1465_v34 = vadd.f32 %v1429_v31, %v1376_v25  ;;  %v1477_v0 = vadd.f32 %v1459_v59, %v1388_v41  ;;  %v2563_v61 = vpop.eup (!%p2317_p0), %2562  ;;  %1585 = vperm.xlu1 (!%p2317_p0), %2553, %v1563_v9  }
 0x4b4   : > { %1480 = vst [vmem:[#allocation5 + $0x10] sm:$0xff] %v1464_v28  ;;  %1492 = vst [vmem:[#allocation5 + $0x70] sm:$0xff] %v1476_v52  ;;  %v1525_v10 = vrot.slane (!%p2317_p0), %v2563_v61, %v3028_v8  ;;  %v1521_v3 = vrot.slane (!%p2317_p0), %v2563_v61, %v3026_v6  ;;  %v1564_v8 = vld [vmem:[%s3462_s7 + $0x20] sm:$0xff] (!%p2317_p0) }
 0x4b5   : > { %1481 = vst [vmem:[#allocation5 + $0x18] sm:$0xff] %v1465_v34  ;;  %1493 = vst [vmem:[#allocation5 + $0x78] sm:$0xff] %v1477_v0  ;;  %1575 = vperm.xlu0 (!%p2317_p0), %2552, %v1561_v46   ;;  %v1581_v46 = vpop.permute.xlu1 (!%p2317_p0), %1580 }
 0x4b7   : > { %v1433_v14 = vpop.f32.mrb[24].mxu0 }
 0x4b8   : > { %v1466_v35 = vadd.f32 %v1433_v14, %v1377_v12  ;;  %v1435_v55 = vpop.f32.mrb[25].mxu0  ;;  %v1565_v14 = vld [vmem:[%s3462_s7 + $0x28] sm:$0xff] (!%p2317_p0) }
 0x4b9   : > { %v1467_v62 = vadd.f32 %v1435_v55, %v1378_v51  ;;  %v1437_v63 = vpop.f32.mrb[26].mxu0  ;;  %v1499_v56 = vld [vmem:[#allocation5] sm:$0xff] (!%p2317_p0)  ;;  %1590 = vperm.xlu0 (!%p2317_p0), %2552, %v1564_v8   ;;  %1595 = vperm.xlu1 (!%p2317_p0), %2553, %v1565_v14  }
 0x4ba   : > { %1482 = vst [vmem:[#allocation5 + $0x20] sm:$0xff] %v1466_v35  ;;  %v1468_v54 = vadd.f32 %v1437_v63, %v1379_v60  ;;  %v1439_v24 = vpop.f32.mrb[27].mxu0  ;;  %v1500_v22 = vld [vmem:[#allocation5 + $0x8] sm:$0xff] (!%p2317_p0)  ;;  %v1528_v23 = vmul.f32 (!%p2317_p0), %v1521_v3, %v1499_v56 }
 0x4bb   : > { %1483 = vst [vmem:[#allocation5 + $0x28] sm:$0xff] %v1467_v62  ;;  %v1469_v2 = vadd.f32 %v1439_v24, %v1380_v19  ;;  %v1501_v53 = vld [vmem:[#allocation5 + $0x10] sm:$0xff] (!%p2317_p0)  ;;  %v1529_v15 = vmul.f32 (!%p2317_p0), %v1525_v10, %v1500_v22  ;;  %v1512_v34 = vld [vmem:[#allocation5 + $0x68] sm:$0xff] (!%p2317_p0)  ;;  %v1511_v19 = vld [vmem:[#allocation5 + $0x60] sm:$0xff] (!%p2317_p0) }
 0x4bc   : > { %1484 = vst [vmem:[#allocation5 + $0x30] sm:$0xff] %v1468_v54  ;;  %v1502_v27 = vld [vmem:[#allocation5 + $0x18] sm:$0xff] (!%p2317_p0)  ;;  %v1530_v25 = vmul.f32 (!%p2317_p0), %v1521_v3, %v1501_v53  ;;  %v1541_v62 = vmul.f32 (!%p2317_p0), %v1525_v10, %v1512_v34  ;;  %v1513_v54 = vld [vmem:[#allocation5 + $0x70] sm:$0xff] (!%p2317_p0)  ;;  %v1566_v24 = vld [vmem:[%s3462_s7 + $0x30] sm:$0xff] (!%p2317_p0)  ;;  %v1540_v33 = vmul.f32 (!%p2317_p0), %v1521_v3, %v1511_v19 }
 0x4bd   : > { %1485 = vst [vmem:[#allocation5 + $0x38] sm:$0xff] %v1469_v2  ;;  %v1531_v21 = vmul.f32 (!%p2317_p0), %v1525_v10, %v1502_v27  ;;  %v1514_v0 = vld [vmem:[#allocation5 + $0x78] sm:$0xff] (!%p2317_p0)  ;;  %v1567_v2 = vld [vmem:[%s3462_s7 + $0x38] sm:$0xff] (!%p2317_p0)  ;;  %v1542_v37 = vmul.f32 (!%p2317_p0), %v1521_v3, %v1513_v54  ;;  %1600 = vperm.xlu0 (!%p2317_p0), %2552, %v1566_v24  }
 0x4be   : > { %v1552_v4 = vpack.c.bf16 (!%p2317_p0), %v1530_v25, %v1528_v23  ;;  %v1543_v63 = vmul.f32 (!%p2317_p0), %v1525_v10, %v1514_v0  ;;  %1605 = vperm.xlu1 (!%p2317_p0), %2553, %v1567_v2  }
 0x4bf   : > { %v1443_v49 = vpop.f32.mrb[28].mxu0  ;;  %1498 = sbr.rel (%p2317_p0) target bundleno = 2266 (0x8da), region = 117  ;;  %v1553_v38 = vpack.c.bf16 (!%p2317_p0), %v1531_v21, %v1529_v15 }
 0x4c0   : > { %v1470_v39 = vadd.f32 %v1443_v49, %v1381_v57  ;;  %v1445_v16 = vpop.f32.mrb[29].mxu0  ;;  %v1559_v57 = vpack.c.bf16 (!%p2317_p0), %v1543_v63, %v1541_v62  ;;  %v1746_v49 = vld [vmem:[%s3464_s9 + $0x8] sm:$0xff] (!%p2317_p0) }
 0x4c1   : > { %v1471_v18 = vadd.f32 %v1445_v16, %v1382_v50  ;;  %v1447_v20 = vpop.f32.mrb[30].mxu0  ;;  %v1503_v5 = vld [vmem:[#allocation5 + $0x20] sm:$0xff] (!%p2317_p0)  ;;  %1640 = vmatprep.subr.bf16.mxu0 (!%p2317_p0), %v1553_v38  ;;  %v1558_v50 = vpack.c.bf16 (!%p2317_p0), %v1542_v37, %v1540_v33  ;;  %1755 = vperm.xlu0 (!%p2317_p0), %2552, %v1745_v58   ;;  %v1748_v16 = vld [vmem:[%s3464_s9 + $0x18] sm:$0xff] (!%p2317_p0) }
 0x4c2   : > { %1486 = vst [vmem:[#allocation5 + $0x40] sm:$0xff] %v1470_v39  ;;  %v1472_v44 = vadd.f32 %v1447_v20, %v1383_v17  ;;  %v1449_v26 = vpop.f32.mrb[31].mxu0  ;;  %v1504_v1 = vld [vmem:[#allocation5 + $0x28] sm:$0xff] (!%p2317_p0)  ;;  %v1532_v31 = vmul.f32 (!%p2317_p0), %v1521_v3, %v1503_v5  ;;  %1641 = vmatpush1.bf16.msra.mxu0 (!%p2317_p0), %v1552_v4  ;;  %1760 = vperm.xlu1 (!%p2317_p0), %2553, %v1746_v49   ;;  %v2554_v17 = vld [vmem:[%s3494_s11] sm:$0xff] (!%p2317_p0)   ;;  %v1750_v20 = vld [vmem:[%s3464_s9 + $0x28] sm:$0xff] (!%p2317_p0) }
 0x4c3   : > { %1487 = vst [vmem:[#allocation5 + $0x48] sm:$0xff] %v1471_v18  ;;  %v1473_v29 = vadd.f32 %v1449_v26, %v1384_v43  ;;  %v1505_v7 = vld [vmem:[#allocation5 + $0x30] sm:$0xff] (!%p2317_p0)  ;;  %v1533_v6 = vmul.f32 (!%p2317_p0), %v1525_v10, %v1504_v1  ;;  %v1747_v39 = vld [vmem:[%s3464_s9 + $0x10] sm:$0xff] (!%p2317_p0)  ;;  %v2555_v26 = vld [vmem:[%s3494_s11 + $0x8] sm:$0xff] (!%p2317_p0)  }
 0x4c4   : > { %1488 = vst [vmem:[#allocation5 + $0x50] sm:$0xff] %v1472_v44  ;;  %v1506_v45 = vld [vmem:[#allocation5 + $0x38] sm:$0xff] (!%p2317_p0)  ;;  %v1534_v59 = vmul.f32 (!%p2317_p0), %v1521_v3, %v1505_v7  ;;  %v1751_v43 = vld [vmem:[%s3464_s9 + $0x30] sm:$0xff] (!%p2317_p0)  ;;  %v1752_v44 = vld [vmem:[%s3464_s9 + $0x38] sm:$0xff] (!%p2317_p0) }
 0x4c5   : > { %1489 = vst [vmem:[#allocation5 + $0x58] sm:$0xff] %v1473_v29  ;;  %v1535_v52 = vmul.f32 (!%p2317_p0), %v1525_v10, %v1506_v45  ;;  %1765 = vperm.xlu0 (!%p2317_p0), %2552, %v1747_v39   ;;  %v1749_v18 = vld [vmem:[%s3464_s9 + $0x20] sm:$0xff] (!%p2317_p0)  ;;  %v2556_v29 = vld [vmem:[%s3494_s11 + $0x10] sm:$0xff] (!%p2317_p0)  }
 0x4c6   : > { %v1554_v51 = vpack.c.bf16 %v1534_v59, %v1532_v31  ;;  %1770 = vperm.xlu1 %2553, %v1748_v16  }
 0x4c7   : > { %v1555_v42 = vpack.c.bf16 %v1535_v52, %v1533_v6 }
 0x4c9   : > { %v1507_v41 = vld [vmem:[#allocation5 + $0x40] sm:$0xff]  ;;  %1642 = vmatprep.subr.bf16.mxu0 %v1555_v42  ;;  %1775 = vperm.xlu0 %2552, %v1749_v18  }
 0x4ca   : > { %v1508_v11 = vld [vmem:[#allocation5 + $0x48] sm:$0xff]  ;;  %v1536_v35 = vmul.f32 %v1521_v3, %v1507_v41  ;;  %1643 = vmatpush1.bf16.msra.mxu0 %v1554_v51  ;;  %1780 = vperm.xlu1 %2553, %v1750_v20  }
 0x4cb   : > { %v1509_v28 = vld [vmem:[#allocation5 + $0x50] sm:$0xff]  ;;  %v1537_v40 = vmul.f32 %v1525_v10, %v1508_v11 }
 0x4cc   : > { %v1510_v13 = vld [vmem:[#allocation5 + $0x58] sm:$0xff]  ;;  %v1538_v55 = vmul.f32 %v1521_v3, %v1509_v28 }
 0x4cd   : > { %v1539_v12 = vmul.f32 %v1525_v10, %v1510_v13  ;;  %1785 = vperm.xlu0 %2552, %v1751_v43  }
 0x4ce   : > { %v1556_v30 = vpack.c.bf16 %v1538_v55, %v1536_v35  ;;  %1790 = vperm.xlu1 %2553, %v1752_v44  }
 0x4cf   : > { %v1557_v60 = vpack.c.bf16 %v1539_v12, %v1537_v40 }
 0x4d1   : > { %1644 = vmatprep.subr.bf16.mxu0 %v1557_v60 }
 0x4d2   : > { %1645 = vmatpush1.bf16.msra.mxu0 %v1556_v30 }
 0x4d3   : > { %1646 = vmatprep.subr.bf16.mxu0 %v1559_v57 }
 0x4d6   : > { %1647 = vmatpush1.bf16.msra.mxu0 %v1558_v50 }
 0x4d9   : > { %2322 = vmatmul.mubr.msk.bf16.vlgmr.msra.gmra.mrb[0].mxu0 %vm814_vm3, %v2554_v17 }
 0x4da   : > { %1682 = vmatprep.mubr.bf16.mxu0 %v2645_v36 }
 0x4e1   : > { %2323 = vmatmul.mubr.msk.bf16.gmra.mrb[4].mxu0 %vm814_vm3, %v2555_v26 }
 0x4e2   : > { %1692 = vmatprep.mubr.bf16.mxu0 %v2645_v36 }
 0x4e9   : > { %2324 = vmatmul.mubr.msk.bf16.gmra.mrb[8].mxu0 %vm814_vm3, %v2556_v29 }
 0x4ea   : > { %1702 = vmatprep.mubr.bf16.mxu0 %v2645_v36 }
 0x4f1   : > { %2325 = vmatmul.mubr.msk.bf16.gmra.mrb[12].mxu0 %vm814_vm3, %v2557_v32 }
 0x530   : > { %v1571_v22 = vpop.permute.xlu0 %1570 }
 0x532   : > { %v1586_v25 = vpop.permute.xlu1 %1585 }
 0x534   : > { %v1576_v53 = vpop.permute.xlu0 %1575 }
 0x538   : > { %v1591_v4 = vpop.permute.xlu0 %1590  ;;  %v1596_v51 = vpop.permute.xlu1 %1595 }
 0x53c   : > { %v1601_v33 = vpop.permute.xlu0 %1600 }
 0x53d   : > { %v1606_v50 = vpop.permute.xlu1 %1605 }
 0x5ac   : > { %v1674_v27 = vpop.f32.mrb[0].mxu0 }
 0x5ad   : > { %v1675_v48 = vadd.f32 %v1674_v27, %v1571_v22  ;;  %v1676_v56 = vpop.f32.mrb[1].mxu0  ;;  %v2558_v27 = vld [vmem:[%s3495_s10] sm:$0xff]  }
 0x5ae   : > { %v1677_v47 = vadd.f32 %v1676_v56, %v1571_v22  ;;  %v1678_v61 = vpop.f32.mrb[2].mxu0  ;;  %v2560_v56 = vld [vmem:[%s3495_s10 + $0x10] sm:$0xff]  }
 0x5af   : > { %v1679_v1 = vadd.f32 %v1678_v61, %v1576_v53  ;;  %v1680_v45 = vpop.f32.mrb[3].mxu0  ;;  %v1713_v3 = vmax.f32 %v1675_v48, 0.0  ;;  %v2559_v48 = vld [vmem:[%s3495_s10 + $0x8] sm:$0xff]  }
 0x5b0   : > { %v1681_v10 = vadd.f32 %v1680_v45, %v1576_v53  ;;  %v1714_v7 = vmax.f32 %v1677_v47, 0.0  ;;  %v2561_v53 = vld [vmem:[%s3495_s10 + $0x18] sm:$0xff]   ;;  %v1756_v47 = vpop.permute.xlu0 %1755 }
 0x5b1   : > { %v1715_v5 = vmax.f32 %v1679_v1, 0.0 }
 0x5b2   : > { %v1716_v9 = vmax.f32 %v1681_v10, 0.0 }
 0x5b3   : > { %v1737_v11 = vpack.c.bf16 %v1715_v5, %v1713_v3 }
 0x5b4   : > { %v1684_v13 = vpop.f32.mrb[4].mxu0  ;;  %v1738_v15 = vpack.c.bf16 %v1716_v9, %v1714_v7 }
 0x5b5   : > { %v1685_v21 = vadd.f32 %v1684_v13, %v1581_v46  ;;  %v1686_v23 = vpop.f32.mrb[5].mxu0  ;;  %v1766_v13 = vpop.permute.xlu0 %1765 }
 0x5b6   : > { %v1687_v41 = vadd.f32 %v1686_v23, %v1581_v46  ;;  %v1688_v28 = vpop.f32.mrb[6].mxu0  ;;  %1825 = vmatprep.subr.bf16.mxu1 %v1738_v15  ;;  %v1761_v46 = vpop.permute.xlu1 %1760 }
 0x5b7   : > { %v1689_v8 = vadd.f32 %v1688_v28, %v1586_v25  ;;  %v1690_v6 = vpop.f32.mrb[7].mxu0  ;;  %1826 = vmatpush1.bf16.msra.mxu1 %v1737_v11  ;;  %v1717_v31 = vmax.f32 %v1685_v21, 0.0 }
 0x5b8   : > { %v1691_v52 = vadd.f32 %v1690_v6, %v1586_v25  ;;  %v1718_v34 = vmax.f32 %v1687_v41, 0.0 }
 0x5b9   : > { %v1719_v59 = vmax.f32 %v1689_v8, 0.0 }
 0x5ba   : > { %v1720_v0 = vmax.f32 %v1691_v52, 0.0  ;;  %v1771_v52 = vpop.permute.xlu1 %1770 }
 0x5bb   : > { %v1739_v38 = vpack.c.bf16 %v1719_v59, %v1717_v31 }
 0x5bc   : > { %v1740_v40 = vpack.c.bf16 %v1720_v0, %v1718_v34  ;;  %v1694_v12 = vpop.f32.mrb[8].mxu0 }
 0x5bd   : > { %v1695_v42 = vadd.f32 %v1694_v12, %v1591_v4  ;;  %v1696_v14 = vpop.f32.mrb[9].mxu0 }
 0x5be   : > { %v1697_v35 = vadd.f32 %v1696_v14, %v1591_v4  ;;  %v1698_v55 = vpop.f32.mrb[10].mxu0  ;;  %1827 = vmatprep.subr.bf16.mxu1 %v1740_v40 }
 0x5bf   : > { %v1699_v60 = vadd.f32 %v1698_v55, %v1596_v51  ;;  %v1700_v62 = vpop.f32.mrb[11].mxu0  ;;  %1828 = vmatpush1.bf16.msra.mxu1 %v1739_v38  ;;  %v1721_v19 = vmax.f32 %v1695_v42, 0.0  ;;  %v1776_v38 = vpop.permute.xlu0 %1775 }
 0x5c0   : > { %v1701_v63 = vadd.f32 %v1700_v62, %v1596_v51  ;;  %v1722_v24 = vmax.f32 %v1697_v35, 0.0 }
 0x5c1   : > { %v1723_v54 = vmax.f32 %v1699_v60, 0.0  ;;  %v1781_v60 = vpop.permute.xlu1 %1780 }
 0x5c2   : > { %v1724_v2 = vmax.f32 %v1701_v63, 0.0 }
 0x5c3   : > { %v1741_v30 = vpack.c.bf16 %v1723_v54, %v1721_v19 }
 0x5c4   : > { %v1742_v37 = vpack.c.bf16 %v1724_v2, %v1722_v24  ;;  %v1704_v57 = vpop.f32.mrb[12].mxu0  ;;  %v1786_v24 = vpop.permute.xlu0 %1785 }
 0x5c5   : > { %v1705_v58 = vadd.f32 %v1704_v57, %v1601_v33  ;;  %v1706_v49 = vpop.f32.mrb[13].mxu0 }
 0x5c6   : > { %v1707_v39 = vadd.f32 %v1706_v49, %v1601_v33  ;;  %v1708_v16 = vpop.f32.mrb[14].mxu0  ;;  %1829 = vmatprep.subr.bf16.mxu1 %v1742_v37 }
 0x5c7   : > { %v1709_v17 = vadd.f32 %v1708_v16, %v1606_v50  ;;  %v1710_v18 = vpop.f32.mrb[15].mxu0  ;;  %1830 = vmatpush1.bf16.msra.mxu1 %v1741_v30  ;;  %v1725_v43 = vmax.f32 %v1705_v58, 0.0 }
 0x5c8   : > { %v1711_v20 = vadd.f32 %v1710_v18, %v1606_v50  ;;  %v1726_v26 = vmax.f32 %v1707_v39, 0.0  ;;  %v1791_v39 = vpop.permute.xlu1 %1790 }
 0x5c9   : > { %v1727_v44 = vmax.f32 %v1709_v17, 0.0 }
 0x5ca   : > { %v1728_v29 = vmax.f32 %v1711_v20, 0.0 }
 0x5cb   : > { %v1743_v32 = vpack.c.bf16 %v1727_v44, %v1725_v43 }
 0x5cc   : > { %v1744_v22 = vpack.c.bf16 %v1728_v29, %v1726_v26 }
 0x5ce   : > { %1831 = vmatprep.subr.bf16.mxu1 %v1744_v22 }
 0x5cf   : > { %1832 = vmatpush1.bf16.msra.mxu1 %v1743_v32 }
 0x5d2   : > { %2330 = vmatmul.mubr.msk.bf16.vlgmr.msra.gmra.mrb[0].mxu1 %vm814_vm3, %v2558_v27 }
 0x5d3   : > { %1867 = vmatprep.mubr.bf16.mxu1 %v2645_v36 }
 0x5da   : > { %2331 = vmatmul.mubr.msk.bf16.gmra.mrb[4].mxu1 %vm814_vm3, %v2559_v48 }
 0x5db   : > { %1877 = vmatprep.mubr.bf16.mxu1 %v2645_v36 }
 0x5e2   : > { %2332 = vmatmul.mubr.msk.bf16.gmra.mrb[8].mxu1 %vm814_vm3, %v2560_v56 }
 0x5e3   : > { %1887 = vmatprep.mubr.bf16.mxu1 %v2645_v36 }
 0x5ea   : > { %2333 = vmatmul.mubr.msk.bf16.gmra.mrb[12].mxu1 %vm814_vm3, %v2561_v53 }
 0x6a5   : > { %v1859_v61 = vpop.f32.mrb[0].mxu1 }
 0x6a6   : > { %v3220_v1 = vadd.f32 %v1859_v61, %v1756_v47  ;;  %v1861_v45 = vpop.f32.mrb[1].mxu1 }
 0x6a7   : > { %v3222_v10 = vadd.f32 %v1861_v45, %v1756_v47  ;;  %v1863_v3 = vpop.f32.mrb[2].mxu1 }
 0x6a8   : > { %v1864_v5 = vadd.f32 %v1863_v3, %v1761_v46  ;;  %v1865_v7 = vpop.f32.mrb[3].mxu1 }
 0x6a9   : > { %v1898_v36 = vadd.f32 %v3222_v10, %v3220_v1  ;;  %v1866_v11 = vadd.f32 %v1865_v7, %v1761_v46 }
 0x6ab   : > { %v1899_v9 = vadd.f32 %v1898_v36, %v1864_v5 }
 0x6ad   : > { %v1900_v15 = vadd.f32 %v1899_v9, %v1866_v11  ;;  %v1869_v21 = vpop.f32.mrb[4].mxu1 }
 0x6ae   : > { %v1870_v23 = vadd.f32 %v1869_v21, %v1766_v13  ;;  %v1871_v25 = vpop.f32.mrb[5].mxu1 }
 0x6af   : > { %v1872_v41 = vadd.f32 %v1871_v25, %v1766_v13  ;;  %v1873_v28 = vpop.f32.mrb[6].mxu1 }
 0x6b0   : > { %v1901_v8 = vadd.f32 %v1900_v15, %v1870_v23  ;;  %v1875_v6 = vpop.f32.mrb[7].mxu1  ;;  %v1874_v59 = vadd.f32 %v1873_v28, %v1771_v52 }
 0x6b1   : > { %v1876_v0 = vadd.f32 %v1875_v6, %v1771_v52 }
 0x6b2   : > { %v1902_v31 = vadd.f32 %v1901_v8, %v1872_v41 }
 0x6b4   : > { %v1903_v34 = vadd.f32 %v1902_v31, %v1874_v59 }
 0x6b5   : > { %v1879_v4 = vpop.f32.mrb[8].mxu1 }
 0x6b6   : > { %v1904_v40 = vadd.f32 %v1903_v34, %v1876_v0  ;;  %v1880_v12 = vadd.f32 %v1879_v4, %v1776_v38  ;;  %v1881_v42 = vpop.f32.mrb[9].mxu1 }
 0x6b7   : > { %v1882_v14 = vadd.f32 %v1881_v42, %v1776_v38  ;;  %v1883_v51 = vpop.f32.mrb[10].mxu1 }
 0x6b8   : > { %v1905_v35 = vadd.f32 %v1904_v40, %v1880_v12  ;;  %v1885_v55 = vpop.f32.mrb[11].mxu1  ;;  %v1884_v63 = vadd.f32 %v1883_v51, %v1781_v60 }
 0x6b9   : > { %v1886_v54 = vadd.f32 %v1885_v55, %v1781_v60 }
 0x6ba   : > { %v1906_v62 = vadd.f32 %v1905_v35, %v1882_v14 }
 0x6bc   : > { %v1907_v19 = vadd.f32 %v1906_v62, %v1884_v63 }
 0x6bd   : > { %v1889_v2 = vpop.f32.mrb[12].mxu1 }
 0x6be   : > { %v1908_v30 = vadd.f32 %v1907_v19, %v1886_v54  ;;  %v1890_v33 = vadd.f32 %v1889_v2, %v1786_v24  ;;  %v1891_v37 = vpop.f32.mrb[13].mxu1 }
 0x6bf   : > { %v1892_v57 = vadd.f32 %v1891_v37, %v1786_v24  ;;  %v1893_v58 = vpop.f32.mrb[14].mxu1 }
 0x6c0   : > { %v1909_v49 = vadd.f32 %v1908_v30, %v1890_v33  ;;  %v1895_v50 = vpop.f32.mrb[15].mxu1  ;;  %v1894_v17 = vadd.f32 %v1893_v58, %v1791_v39 }
 0x6c1   : > { %v1896_v20 = vadd.f32 %v1895_v50, %v1791_v39 }
 0x6c2   : > { %v1910_v16 = vadd.f32 %v1909_v49, %v1892_v57 }
 0x6c4   : > { %v1911_v18 = vadd.f32 %v1910_v16, %v1894_v17 }
 0x6c6   : > { %v1912_v43 = vadd.f32 %v1911_v18, %v1896_v20 }
 0x6c8   : > { %1913 = vadd.xlane.f32.xlu0 %v1912_v43 }
 0x755   : > { %v1914_v44 = vpop.xlane.xlu0 %1913 }
 0x756   : > { %v1915_v26 = vrot.slane %v1914_v44, 4 }
 0x758   : > { %v1916_v29 = vadd.f32 %v1915_v26, %v1914_v44  ;;  %v3295_v44 = vld [vmem:[%s3496_s19] sm:$0xff]  ;;  %v3300_v26 = vld [vmem:[%s3496_s19 + $0x8] sm:$0xff] }
 0x75a   : > { %v1917_v32 = vrot.slane %v1916_v29, 2 }
 0x75c   : > { %v1918_v22 = vadd.f32 %v1917_v32, %v1916_v29  ;;  %v3305_v29 = vld [vmem:[%s3496_s19 + $0x10] sm:$0xff]  ;;  %v3310_v32 = vld [vmem:[%s3496_s19 + $0x18] sm:$0xff] }
 0x75e   : > { %v1919_v27 = vrot.slane %v1918_v22, 1 }
 0x760   : > { %v1920_v48 = vadd.f32 %v1919_v27, %v1918_v22  ;;  %v3315_v22 = vld [vmem:[%s3496_s19 + $0x20] sm:$0xff]  ;;  %v3320_v27 = vld [vmem:[%s3496_s19 + $0x28] sm:$0xff] }
 0x762   : > { %2406 = vpush %v1920_v48  ;;  %v3325_v48 = vld [vmem:[%s3496_s19 + $0x30] sm:$0xff] }
 0x793   : > { %s2407_s30 = spop %2406 }
 0x794   : > { %s1924_s13 = smul.f32 6.1035156e-05, %s2407_s30  ;;  %s3498_s30 = smov %s3497_s25 }
 0x796   : > { %v1925_v56 = vstv %s1924_s13 }
 0x797   : > { %v3227_v53 = vsub.f32 %v3220_v1, %v1925_v56  ;;  %v3230_v47 = vsub.f32 %v3222_v10, %v1925_v56  ;;  %v3232_v61 = vsub.f32 %v1864_v5, %v1925_v56  ;;  %v3238_v3 = vsub.f32 %v1866_v11, %v1925_v56 }
 0x798   : > { %v3240_v7 = vsub.f32 %v1870_v23, %v1925_v56  ;;  %v3244_v9 = vsub.f32 %v1872_v41, %v1925_v56  ;;  %v3248_v13 = vsub.f32 %v1874_v59, %v1925_v56  ;;  %v3252_v11 = vsub.f32 %v1876_v0, %v1925_v56 }
 0x799   : > { %v1942_v45 = vmul.f32 %v3227_v53, %v3227_v53  ;;  %v1943_v46 = vmul.f32 %v3230_v47, %v3230_v47  ;;  %v1944_v36 = vmul.f32 %v3232_v61, %v3232_v61  ;;  %v1945_v10 = vmul.f32 %v3238_v3, %v3238_v3 }
 0x79a   : > { %v1946_v15 = vmul.f32 %v3240_v7, %v3240_v7  ;;  %v1947_v23 = vmul.f32 %v3244_v9, %v3244_v9  ;;  %v3256_v28 = vsub.f32 %v1880_v12, %v1925_v56  ;;  %v1948_v41 = vmul.f32 %v3248_v13, %v3248_v13 }
 0x79b   : > { %v1958_v1 = vadd.f32 %v1943_v46, %v1942_v45  ;;  %v3260_v6 = vsub.f32 %v1882_v14, %v1925_v56  ;;  %v1949_v52 = vmul.f32 %v3252_v11, %v3252_v11  ;;  %v3264_v59 = vsub.f32 %v1884_v63, %v1925_v56  ;;  %v3331_v45 = vld [vmem:[%s3496_s19 + $0x38] sm:$0xff] }
 0x79c   : > { %v1950_v34 = vmul.f32 %v3256_v28, %v3256_v28  ;;  %v3268_v38 = vsub.f32 %v1886_v54, %v1925_v56  ;;  %v3272_v12 = vsub.f32 %v1890_v33, %v1925_v56  ;;  %v3276_v51 = vsub.f32 %v1892_v57, %v1925_v56 }
 0x79d   : > { %v1959_v5 = vadd.f32 %v1958_v1, %v1944_v36  ;;  %v1951_v4 = vmul.f32 %v3260_v6, %v3260_v6  ;;  %v1952_v42 = vmul.f32 %v3264_v59, %v3264_v59  ;;  %v3280_v60 = vsub.f32 %v1894_v17, %v1925_v56 }
 0x79e   : > { %v1953_v35 = vmul.f32 %v3268_v38, %v3268_v38  ;;  %v1954_v62 = vmul.f32 %v3272_v12, %v3272_v12  ;;  %v3284_v19 = vsub.f32 %v1896_v20, %v1925_v56  ;;  %v1955_v54 = vmul.f32 %v3276_v51, %v3276_v51 }
 0x79f   : > { %v1960_v21 = vadd.f32 %v1959_v5, %v1945_v10  ;;  %v1956_v2 = vmul.f32 %v3280_v60, %v3280_v60  ;;  %v2014_v56 = vunpack.c.l.bf16 %v3295_v44  ;;  %v2015_v46 = vunpack.c.h.bf16 %v3295_v44  ;;  %v3340_v5 = vld [vmem:[%s3497_s25] sm:$0xff] }
 0x7a0   : > { %v1957_v33 = vmul.f32 %v3284_v19, %v3284_v19  ;;  %v2016_v36 = vunpack.c.l.bf16 %v3300_v26  ;;  %v2017_v1 = vunpack.c.h.bf16 %v3300_v26  ;;  %v2018_v10 = vunpack.c.l.bf16 %v3305_v29 }
 0x7a1   : > { %v1961_v25 = vadd.f32 %v1960_v21, %v1946_v15  ;;  %v2019_v15 = vunpack.c.h.bf16 %v3305_v29  ;;  %v2020_v21 = vunpack.c.l.bf16 %v3310_v32 }
 0x7a3   : > { %v1962_v8 = vadd.f32 %v1961_v25, %v1947_v23  ;;  %v2021_v23 = vunpack.c.h.bf16 %v3310_v32  ;;  %v2022_v25 = vunpack.c.l.bf16 %v3315_v22 }
 0x7a5   : > { %v1963_v31 = vadd.f32 %v1962_v8, %v1948_v41  ;;  %v3349_v41 = vld [vmem:[%s3498_s30 + $0x8] sm:$0xff]  ;;  %v3354_v8 = vld [vmem:[%s3498_s30 + $0x10] sm:$0xff] }
 0x7a7   : > { %v1964_v0 = vadd.f32 %v1963_v31, %v1949_v52  ;;  %v2023_v52 = vunpack.c.h.bf16 %v3315_v22  ;;  %v2024_v31 = vunpack.c.l.bf16 %v3320_v27 }
 0x7a9   : > { %v1965_v40 = vadd.f32 %v1964_v0, %v1950_v34  ;;  %v2025_v34 = vunpack.c.h.bf16 %v3320_v27  ;;  %v2026_v0 = vunpack.c.l.bf16 %v3325_v48 }
 0x7ab   : > { %v1966_v14 = vadd.f32 %v1965_v40, %v1951_v4  ;;  %v3363_v4 = vld [vmem:[%s3498_s30 + $0x18] sm:$0xff]  ;;  %v3368_v40 = vld [vmem:[%s3498_s30 + $0x20] sm:$0xff] }
 0x7ad   : > { %v1967_v55 = vadd.f32 %v1966_v14, %v1952_v42  ;;  %v2027_v42 = vunpack.c.h.bf16 %v3325_v48  ;;  %v2028_v14 = vunpack.c.l.bf16 %v3331_v45 }
 0x7af   : > { %v1968_v63 = vadd.f32 %v1967_v55, %v1953_v35  ;;  %v2029_v35 = vunpack.c.h.bf16 %v3331_v45  ;;  %v3376_v55 = vld [vmem:[%s3498_s30 + $0x28] sm:$0xff] }
 0x7b1   : > { %v1969_v24 = vadd.f32 %v1968_v63, %v1954_v62  ;;  %v3381_v62 = vld [vmem:[%s3498_s30 + $0x30] sm:$0xff]  ;;  %v2054_v63 = vunpack.c.l.bf16 %v3340_v5 }
 0x7b3   : > { %v1970_v30 = vadd.f32 %v1969_v24, %v1955_v54  ;;  %v3387_v54 = vld [vmem:[%s3498_s30 + $0x38] sm:$0xff]  ;;  %v2055_v24 = vunpack.c.h.bf16 %v3340_v5 }
 0x7b4   : > { %v2069_v44 = vunpack.c.h.bf16 %v3387_v54 }
 0x7b5   : > { %v1971_v37 = vadd.f32 %v1970_v30, %v1956_v2  ;;  %v2056_v2 = vunpack.c.l.bf16 %v3349_v41  ;;  %v2057_v30 = vunpack.c.h.bf16 %v3349_v41 }
 0x7b7   : > { %v1972_v57 = vadd.f32 %v1971_v37, %v1957_v33  ;;  %v2058_v33 = vunpack.c.l.bf16 %v3354_v8  ;;  %v2059_v37 = vunpack.c.h.bf16 %v3354_v8 }
 0x7b9   : > { %1973 = vadd.xlane.f32.xlu1 %v1972_v57  ;;  %v2060_v57 = vunpack.c.l.bf16 %v3363_v4 }
 0x846   : > { %v1974_v58 = vpop.xlane.xlu1 %1973 }
 0x847   : > { %v1975_v49 = vrot.slane %v1974_v58, 4 }
 0x849   : > { %v1976_v50 = vadd.f32 %v1975_v49, %v1974_v58  ;;  %v2061_v58 = vunpack.c.h.bf16 %v3363_v4  ;;  %v2062_v49 = vunpack.c.l.bf16 %v3368_v40 }
 0x84b   : > { %v1977_v39 = vrot.slane %v1976_v50, 2 }
 0x84d   : > { %v1978_v16 = vadd.f32 %v1977_v39, %v1976_v50  ;;  %v2063_v50 = vunpack.c.h.bf16 %v3368_v40  ;;  %v2064_v39 = vunpack.c.l.bf16 %v3376_v55 }
 0x84f   : > { %v1979_v17 = vrot.slane %v1978_v16, 1 }
 0x851   : > { %v1980_v18 = vadd.f32 %v1979_v17, %v1978_v16  ;;  %v2065_v16 = vunpack.c.h.bf16 %v3376_v55  ;;  %v2066_v17 = vunpack.c.l.bf16 %v3381_v62 }
 0x853   : > { %2408 = vpush %v1980_v18 }
 0x884   : > { %s2409_s14 = spop %2408 }
 0x885   : > { %s1984_s15 = smul.f32 6.1035156e-05, %s2409_s14 }
 0x887   : > { %s1985_s16 = sadd.f32 1e-05, %s1984_s15 }
 0x889   : > { %v1986_v20 = vstv %s1985_s16 }
 0x88a   : > { %2564 = vrsqrt.f32 %v1986_v20  ;;  %v2067_v20 = vunpack.c.h.bf16 %v3381_v62 }
 0x894   : > { %v2565_v43 = vpop.eup %2564 }
 0x895   : > { %2410 = vpush %v2565_v43  ;;  %v2068_v43 = vunpack.c.l.bf16 %v3387_v54 }
 0x8c6   : > { %s2411_s13 = spop %2410 }
 0x8c7   : > { %v1989_v18 = vstv %s2411_s13 }
 0x8c8   : > { %v1990_v26 = vmul.f32 %v1989_v18, %v3227_v53  ;;  %v1991_v29 = vmul.f32 %v1989_v18, %v3230_v47  ;;  %v1992_v32 = vmul.f32 %v1989_v18, %v3232_v61  ;;  %v1993_v22 = vmul.f32 %v1989_v18, %v3238_v3 }
 0x8c9   : > { %v1994_v27 = vmul.f32 %v1989_v18, %v3240_v7  ;;  %v1995_v48 = vmul.f32 %v1989_v18, %v3244_v9  ;;  %v1996_v45 = vmul.f32 %v1989_v18, %v3248_v13  ;;  %v1997_v5 = vmul.f32 %v1989_v18, %v3252_v11 }
 0x8ca   : > { %v1998_v41 = vmul.f32 %v1989_v18, %v3256_v28  ;;  %v1999_v8 = vmul.f32 %v1989_v18, %v3260_v6  ;;  %v2000_v53 = vmul.f32 %v1989_v18, %v3264_v59  ;;  %v2001_v47 = vmul.f32 %v1989_v18, %v3268_v38 }
 0x8cb   : > { %v2002_v61 = vmul.f32 %v1989_v18, %v3272_v12  ;;  %v2003_v3 = vmul.f32 %v1989_v18, %v3276_v51  ;;  %v2004_v7 = vmul.f32 %v1989_v18, %v3280_v60  ;;  %v2005_v9 = vmul.f32 %v1989_v18, %v3284_v19 }
 0x8cc   : > { %v2030_v4 = vmul.f32 %v2014_v56, %v1990_v26  ;;  %v2031_v13 = vmul.f32 %v2015_v46, %v1991_v29  ;;  %v2032_v40 = vmul.f32 %v2016_v36, %v1992_v32  ;;  %v2033_v11 = vmul.f32 %v2017_v1, %v1993_v22 }
 0x8cd   : > { %v2034_v55 = vmul.f32 %v2018_v10, %v1994_v27  ;;  %v2035_v28 = vmul.f32 %v2019_v15, %v1995_v48  ;;  %v2036_v62 = vmul.f32 %v2020_v21, %v1996_v45  ;;  %v2037_v6 = vmul.f32 %v2021_v23, %v1997_v5 }
 0x8ce   : > { %v2038_v54 = vmul.f32 %v2022_v25, %v1998_v41  ;;  %v2039_v59 = vmul.f32 %v2023_v52, %v1999_v8  ;;  %v2040_v38 = vmul.f32 %v2024_v31, %v2000_v53  ;;  %v2041_v12 = vmul.f32 %v2025_v34, %v2001_v47 }
 0x8cf   : > { %v2042_v51 = vmul.f32 %v2026_v0, %v2002_v61  ;;  %v2043_v60 = vmul.f32 %v2027_v42, %v2003_v3  ;;  %v2044_v18 = vmul.f32 %v2028_v14, %v2004_v7  ;;  %v2045_v19 = vmul.f32 %v2029_v35, %v2005_v9 }
 0x8d0   : > { %v2070_v26 = vadd.f32 %v2054_v63, %v2030_v4  ;;  %v2071_v56 = vadd.f32 %v2055_v24, %v2031_v13  ;;  %v2072_v29 = vadd.f32 %v2056_v2, %v2032_v40  ;;  %v2073_v46 = vadd.f32 %v2057_v30, %v2033_v11 }
 0x8d1   : > { %v2074_v32 = vadd.f32 %v2058_v33, %v2034_v55  ;;  %v2075_v36 = vadd.f32 %v2059_v37, %v2035_v28  ;;  %v2076_v1 = vadd.f32 %v2060_v57, %v2036_v62  ;;  %v2077_v22 = vadd.f32 %v2061_v58, %v2037_v6 }
 0x8d2   : > { %v2078_v10 = vadd.f32 %v2062_v49, %v2038_v54  ;;  %v2079_v15 = vadd.f32 %v2063_v50, %v2039_v59  ;;  %v2080_v21 = vadd.f32 %v2064_v39, %v2040_v38  ;;  %v2081_v23 = vadd.f32 %v2065_v16, %v2041_v12 }
 0x8d3   : > { %v2082_v25 = vadd.f32 %v2066_v17, %v2042_v51  ;;  %v2083_v52 = vadd.f32 %v2067_v20, %v2043_v60  ;;  %v2084_v31 = vadd.f32 %v2068_v43, %v2044_v18  ;;  %v2085_v34 = vadd.f32 %v2069_v44, %v2045_v19 }
 0x8d4   : > { %v2345_v0 = vpack.c.bf16 %v2071_v56, %v2070_v26  ;;  %v2346_v42 = vpack.c.bf16 %v2073_v46, %v2072_v29  ;;  %v2347_v14 = vpack.c.bf16 %v2075_v36, %v2074_v32  ;;  %v2348_v35 = vpack.c.bf16 %v2077_v22, %v2076_v1 }
 0x8d5   : > { %v2349_v63 = vpack.c.bf16 %v2079_v15, %v2078_v10  ;;  %v2350_v24 = vpack.c.bf16 %v2081_v23, %v2080_v21  ;;  %v2351_v2 = vpack.c.bf16 %v2083_v52, %v2082_v25  ;;  %v2352_v30 = vpack.c.bf16 %v2085_v34, %v2084_v31 }
 0x8d6   : > { %2134 = vst [vmem:[%s2806_s8] sm:$0xff] %v2345_v0  ;;  %2135 = vst [vmem:[%s2806_s8 + $0x8] sm:$0xff] %v2346_v42 }
 0x8d7   : > { %2136 = vst [vmem:[%s2806_s8 + $0x10] sm:$0xff] %v2347_v14  ;;  %2137 = vst [vmem:[%s2806_s8 + $0x18] sm:$0xff] %v2348_v35 }
 0x8d8   : > { %2138 = vst [vmem:[%s2806_s8 + $0x20] sm:$0xff] %v2349_v63  ;;  %2139 = vst [vmem:[%s2806_s8 + $0x28] sm:$0xff] %v2350_v24 }
 0x8d9   : > { %2140 = vst [vmem:[%s2806_s8 + $0x30] sm:$0xff] %v2351_v2  ;;  %2141 = vst [vmem:[%s2806_s8 + $0x38] sm:$0xff] %v2352_v30 }
 0x8da PF: > { %s22_s29 = sadd.s32 1, %s2636_s29   ;;  %s3499_s25 = sld [smem:[#allocation7_spill]] }
 0x8db   : > { %p19_p1 = scmp.ge.s32.totalorder %s22_s29, 10   ;;  %s3500_s14 = sld [smem:[#allocation8_spill]] }
 0x8dc   : > { %s3501_s15 = sld [smem:[#allocation9_spill]]  ;;  %s3502_s28 = sld [smem:[#allocation10_spill]] }
 0x8dd   : > { %s3503_s21 = smov %s2608_s22  ;;  %s3504_s22 = smov %s2782_s6 }
 0x8de   : > { %s3505_s23 = smov %s2624_s26  ;;  %s3506_s24 = smov %s2628_s27 }
 0x8df   :  { %21 = sbr.rel (!%p19_p1) target bundleno = 10 (0xa), region = 155 }
 0x8e1   : > { %s3507_s26 = smov %s3500_s14 }
 0x8e2   : > { %s3508_s27 = smov %s3501_s15 }

</bundles_post_ra>
